<compile_context>
chip_gen: v6e
topology: v6e:2x2x1
jax: 0.10.0
libtpu: 0.0.40
codegen_flags: <defaults>
</compile_context>

<pallas_src>
import math
import jax
import jax.numpy as jnp
from jax.experimental import pallas as pl
from jax.experimental.pallas import tpu as pltpu

# ------------------------- model constants (small test config) -------------------------
VOCAB_SIZE = 64
PADDED_VOCAB = 128            # next_multiple_of_n(VOCAB_SIZE, n=128)
BOS_TOKEN_ID = 0
MASK_TOKEN_ID = 63
NUM_LAYERS = 3
DIM = 32
NUM_HEADS = 4
HEAD_DIM = DIM // NUM_HEADS   # 8
MLP_RATIO = 4
SEQ_LEN = 8
MAX_SEQ_LEN = 16
EPS = 1e-6                    # rms_norm epsilon


def _rms(z):
    return z * jax.lax.rsqrt(jnp.mean(z * z, axis=-1, keepdims=True) + EPS)


# ------------------------------------ kernel ------------------------------------
def diffusion_kernel(lam_ref,                                    # SMEM (L, 1): Block lambdas
                     ids_ref, embed_ref, te_ref,                 # tokens, embedding table, time emb (1,D)
                     rope_ref, gmat_ref, pmat_ref,               # RoPE tables + constant matrices
                     hmask_ref, segsum_ref, bias_ref, lmw_ref,   # head selector, segment-sum, doc bias, lm head
                     wq_ref, wk_ref, wv_ref, wo_ref, wf_ref, wp_ref,   # stacked (L, in, out) weights
                     logits_ref):                                # output (T, PADDED_VOCAB)
    T = ids_ref.shape[0]
    V, D = embed_ref.shape
    H = NUM_HEADS

    # ---- prologue: embedding lookup (one-hot matmul), norm, + time embedding ----
    oh = (ids_ref[...] == jax.lax.broadcasted_iota(jnp.int32, (T, V), 1)).astype(jnp.float32)
    x = _rms(jnp.dot(oh, embed_ref[...], preferred_element_type=jnp.float32)) + te_ref[...]

    gmat = gmat_ref[...]        # (D, D) block-diagonal 1/hd  -> per-head mean of squares
    pmat = pmat_ref[...]        # (D, D) in-head half-rotation permutation (RoPE partner)
    hmask = hmask_ref[...]      # (H*T, D) head selector for block-diagonal k/v layout
    segsum = segsum_ref[...]    # (H*T, H*T) per-head row-sum (softmax denominator broadcast)
    bias = bias_ref[...]        # (T, H*T) additive document-mask bias (0 / -1e30), tiled per head
    qcos, qsin = rope_ref[0], rope_ref[1]   # q tables carry the 1/sqrt(hd) attention scale
    kcos, ksin = rope_ref[2], rope_ref[3]

    # ---- transformer blocks: static unroll, all weights resident in VMEM ----
    for l in range(NUM_LAYERS):
        x = x * lam_ref[l, 0]                                   # Block.lambdas[0]
        xn = _rms(x)

        q = jnp.dot(xn, wq_ref[l], preferred_element_type=jnp.float32)
        k = jnp.dot(xn, wk_ref[l], preferred_element_type=jnp.float32)
        v = jnp.dot(xn, wv_ref[l], preferred_element_type=jnp.float32)   # attn lambda folded in

        # per-head rms_norm, all heads at once (no lane slicing)
        q = q * jax.lax.rsqrt(jnp.dot(q * q, gmat, preferred_element_type=jnp.float32) + EPS)
        k = k * jax.lax.rsqrt(jnp.dot(k * k, gmat, preferred_element_type=jnp.float32) + EPS)

        # RoPE for all heads at once: out = x*cos + (x @ P)*sin
        q = q * qcos + jnp.dot(q, pmat, preferred_element_type=jnp.float32) * qsin
        k = k * kcos + jnp.dot(k, pmat, preferred_element_type=jnp.float32) * ksin

        # all-head attention via block-diagonal (H*T, D) key/value layout: 3 matmuls total,
        # no per-head loop, no reshape/transpose, everything stays 2-D and lane-aligned.
        k_blk = jnp.concatenate([k] * H, axis=0) * hmask        # (H*T, D)
        v_blk = jnp.concatenate([v] * H, axis=0) * hmask        # (H*T, D)
        s = jax.lax.dot_general(q, k_blk, (((1,), (1,)), ((), ())),
                                preferred_element_type=jnp.float32) + bias   # (T, H*T)
        e = jnp.exp(s)                                          # bounded scores; -1e30 -> exactly 0
        denom = jnp.dot(e, segsum, preferred_element_type=jnp.float32)
        p = e * pl.reciprocal(denom, approx=True)
        ctx = jnp.dot(p, v_blk, preferred_element_type=jnp.float32)          # (T, D), head-interleaved
        x = x + jnp.dot(ctx, wo_ref[l], preferred_element_type=jnp.float32)

        # MLP
        xm = _rms(x)
        h1 = jnp.maximum(jnp.dot(xm, wf_ref[l], preferred_element_type=jnp.float32), 0.0)
        x = x + jnp.dot(h1, wp_ref[l], preferred_element_type=jnp.float32)

    # ---- epilogue: final norm, lm_head, logit squashing ----
    xf = _rms(x)
    logits = jnp.dot(xf, lmw_ref[...], preferred_element_type=jnp.float32)
    z = logits * (1.0 / (7.5 * math.sqrt(D)))
    logits_ref[...] = (30.0 / (1.0 + jnp.exp(-z))).astype(logits_ref.dtype)


# ------------------------------------ wrapper ------------------------------------
def diffusion_forward(input_seq, t, params):
    """input_seq: (T,) int token ids, t: scalar timestep. Returns logits (1, T, PADDED_VOCAB)."""
    T, D = input_seq.shape[0], DIM

    # sinusoidal time features + 2-layer time MLP hoisted to XLA (single-row matmuls are the
    # worst MXU shape; doing them here removes two MXU pushes from the kernel)
    half_d = D // 2
    freq = jnp.exp(jnp.arange(half_d, dtype=jnp.float32) * (-math.log(10000.0) / (half_d - 1)))
    args = jnp.asarray(t, jnp.float32) * freq
    sin_emb = jnp.concatenate([jnp.sin(args), jnp.cos(args)])[None, :]          # (1, D)
    te = jnp.maximum(sin_emb @ params["time_w1"] + params["time_b1"], 0.0)
    te = te @ params["time_w2"] + params["time_b2"]                             # (1, D)

    # flex_attention BlockMask (same-document via BOS cumsum) -> dense additive bias, tiled per head
    docs = jnp.cumsum((input_seq == BOS_TOKEN_ID).astype(jnp.int32))
    attn_bias = jnp.where(docs[:, None] == docs[None, :], 0.0, -1e30).astype(jnp.float32)
    bias_big = jnp.tile(attn_bias, (1, NUM_HEADS))                              # (T, H*T)

    ids = input_seq.astype(jnp.int32).reshape(T, 1)
    wv_eff = params["wv"] * params["lam_attn"][:, None, None]                   # fold attn lambda into v proj

    tensors = [ids, params["embed"], te,
               params["rope_tabs"], params["gmat"], params["pmat"],
               params["head_mask"], params["segsum"], bias_big, params["lm_w"],
               params["wq"], params["wk"], wv_eff, params["wo"], params["wf"], params["wp"]]

    vmem = pl.BlockSpec(memory_space=pltpu.MemorySpace.VMEM)
    in_specs = [pl.BlockSpec(memory_space=pltpu.MemorySpace.SMEM)] + [vmem] * len(tensors)

    logits = pl.pallas_call(
        diffusion_kernel,
        in_specs=in_specs,
        out_specs=pl.BlockSpec(memory_space=pltpu.MemorySpace.VMEM),
        out_shape=jax.ShapeDtypeStruct((T, PADDED_VOCAB), jnp.float32),
    )(params["lam_block"], *tensors)
    return logits[None]                                                         # (1, T, PADDED_VOCAB)


# ------------------------------------ params ------------------------------------
def init_params(key):
    ks = jax.random.split(key, 10)
    std = 0.5 * DIM ** -0.5
    bound = math.sqrt(3.0) * std
    qkv = jax.random.uniform(ks[0], (NUM_LAYERS, 3, DIM, DIM), jnp.float32, -bound, bound)
    wq = jnp.swapaxes(qkv[:, 0], 1, 2)     # pre-transposed to (in, out)
    wk = jnp.swapaxes(qkv[:, 1], 1, 2)
    wv = jnp.swapaxes(qkv[:, 2], 1, 2)
    # NOTE: the reference zero-inits attn.c_proj / mlp.c_proj / lm_head weights; small random
    # values are used here instead so the full compute path is exercised.
    wo = 0.02 * jax.random.normal(ks[1], (NUM_LAYERS, DIM, DIM), jnp.float32)
    wf = 0.02 * jax.random.normal(ks[2], (NUM_LAYERS, DIM, MLP_RATIO * DIM), jnp.float32)
    wp = 0.02 * jax.random.normal(ks[3], (NUM_LAYERS, MLP_RATIO * DIM, DIM), jnp.float32)
    embed = 0.1 * jax.random.normal(ks[4], (VOCAB_SIZE, DIM), jnp.float32)
    time_w1 = 0.1 * jax.random.normal(ks[5], (DIM, DIM), jnp.float32)
    time_b1 = 0.02 * jax.random.normal(ks[6], (1, DIM), jnp.float32)
    time_w2 = 0.1 * jax.random.normal(ks[7], (DIM, DIM), jnp.float32)
    time_b2 = 0.02 * jax.random.normal(ks[8], (1, DIM), jnp.float32)
    lm_w = 0.02 * jax.random.normal(ks[9], (DIM, PADDED_VOCAB), jnp.float32)
    lam_block = jnp.ones((NUM_LAYERS, 1), jnp.float32)           # Block lambdas (init 1.0), SMEM scalars
    lam_attn = 0.5 * jnp.ones((NUM_LAYERS,), jnp.float32)        # attn lambdas (init 0.5), folded into wv

    # RoPE tables (modded-nanogpt Rotary: hd//4 real freqs + hd//4 zeros), tiled to full width
    # with the sin sign folded in and 1/sqrt(head_dim) folded into the q-side tables.
    ang = (1.0 / 1024.0) ** jnp.linspace(0.0, 1.0, HEAD_DIM // 4)
    ang = jnp.concatenate([ang, jnp.zeros(HEAD_DIM // 4, jnp.float32)])
    theta = jnp.outer(jnp.arange(MAX_SEQ_LEN, dtype=jnp.float32), ang)
    cos_h = jnp.cos(theta)[:SEQ_LEN]
    sin_h = jnp.sin(theta)[:SEQ_LEN]
    cos_full = jnp.tile(jnp.concatenate([cos_h, cos_h], axis=-1), (1, NUM_HEADS))
    sin_full = jnp.tile(jnp.concatenate([sin_h, -sin_h], axis=-1), (1, NUM_HEADS))
    scale = 1.0 / math.sqrt(HEAD_DIM)
    rope_tabs = jnp.stack([cos_full * scale, sin_full * scale, cos_full, sin_full])   # (4, T, D)

    # Constant matrices so per-head rms_norm / RoPE / attention run full-width on the MXU:
    #   gmat: block-diagonal per-head mean (1/hd); pmat: in-head half-rotation permutation;
    #   head_mask: (H*T, D) selector for the block-diagonal k/v layout;
    #   segsum: (H*T, H*T) per-head segment-sum matrix for the softmax denominator.
    idx = jnp.arange(DIM)
    same_head = (idx[:, None] // HEAD_DIM) == (idx[None, :] // HEAD_DIM)
    gmat = jnp.where(same_head, 1.0 / HEAD_DIM, 0.0).astype(jnp.float32)
    half = HEAD_DIM // 2
    partner = (idx // HEAD_DIM) * HEAD_DIM + (idx % HEAD_DIM + half) % HEAD_DIM
    pmat = (idx[:, None] == partner[None, :]).astype(jnp.float32)

    row = jnp.arange(NUM_HEADS * SEQ_LEN)
    head_mask = ((row[:, None] // SEQ_LEN) == (idx[None, :] // HEAD_DIM)).astype(jnp.float32)
    segsum = ((row[:, None] // SEQ_LEN) == (row[None, :] // SEQ_LEN)).astype(jnp.float32)

    return dict(wq=wq, wk=wk, wv=wv, wo=wo, wf=wf, wp=wp, embed=embed,
                time_w1=time_w1, time_b1=time_b1, time_w2=time_w2, time_b2=time_b2,
                lm_w=lm_w, lam_block=lam_block, lam_attn=lam_attn,
                rope_tabs=rope_tabs, gmat=gmat, pmat=pmat, head_mask=head_mask, segsum=segsum)


if __name__ == "__main__":
    key = jax.random.PRNGKey(0)
    pkey, skey = jax.random.split(key)
    params = init_params(pkey)

    input_seq = jax.random.randint(skey, (SEQ_LEN,), 0, VOCAB_SIZE, dtype=jnp.int32)
    input_seq = input_seq.at[0].set(BOS_TOKEN_ID)     # start of a document
    input_seq = input_seq.at[5].set(MASK_TOKEN_ID)    # a masked position, as in generate()
    t = jnp.array(3, jnp.int32)

    logits = diffusion_forward(input_seq, t, params)
    jax.block_until_ready(logits)

    assert logits.shape == (1, SEQ_LEN, PADDED_VOCAB)
    assert bool(jnp.all(jnp.isfinite(logits)))
    assert bool(jnp.all((logits > 0.0) & (logits < 30.0)))   # logits = 30 * sigmoid(...)
    print("KERNEL_OK")
</pallas_src>

<mosaic_0001>
module attributes {stable_mosaic.version = 11 : i64} {
  func.func @diffusion_kernel(%arg0: memref<3x1xf32, #tpu.memory_space<smem>>, %arg1: memref<8x1xi32, #tpu.memory_space<vmem>>, %arg2: memref<64x32xf32, #tpu.memory_space<vmem>>, %arg3: memref<1x32xf32, #tpu.memory_space<vmem>>, %arg4: memref<4x8x32xf32, #tpu.memory_space<vmem>>, %arg5: memref<32x32xf32, #tpu.memory_space<vmem>>, %arg6: memref<32x32xf32, #tpu.memory_space<vmem>>, %arg7: memref<32x32xf32, #tpu.memory_space<vmem>>, %arg8: memref<32x32xf32, #tpu.memory_space<vmem>>, %arg9: memref<8x32xf32, #tpu.memory_space<vmem>>, %arg10: memref<32x128xf32, #tpu.memory_space<vmem>>, %arg11: memref<3x32x32xf32, #tpu.memory_space<vmem>>, %arg12: memref<3x32x32xf32, #tpu.memory_space<vmem>>, %arg13: memref<3x32x32xf32, #tpu.memory_space<vmem>>, %arg14: memref<3x32x32xf32, #tpu.memory_space<vmem>>, %arg15: memref<3x32x128xf32, #tpu.memory_space<vmem>>, %arg16: memref<3x128x32xf32, #tpu.memory_space<vmem>>, %arg17: memref<8x128xf32, #tpu.memory_space<vmem>>) attributes {dimension_semantics = [], scalar_prefetch = 0 : i64, scratch_operands = 0 : i64, tpu.core_type = #tpu.core_type<tc>} {
    %c0 = arith.constant 0 : index
    %c0_0 = arith.constant 0 : index
    %0 = vector.load %arg1[%c0, %c0_0] : memref<8x1xi32, #tpu.memory_space<vmem>>, vector<8x1xi32>
    %1 = tpu.iota {dimensions = array<i32: 1>} : vector<8x64xi32>
    %2 = vector.broadcast %0 : vector<8x1xi32> to vector<8x64xi32>
    %3 = arith.cmpi eq, %2, %1 : vector<8x64xi32>
    %4 = arith.extui %3 : vector<8x64xi1> to vector<8x64xi32>
    %5 = arith.sitofp %4 : vector<8x64xi32> to vector<8x64xf32>
    %c0_1 = arith.constant 0 : index
    %c0_2 = arith.constant 0 : index
    %6 = vector.load %arg2[%c0_1, %c0_2] : memref<64x32xf32, #tpu.memory_space<vmem>>, vector<64x32xf32>
    %cst = arith.constant dense<0.000000e+00> : vector<8x32xf32>
    %7 = tpu.matmul %5, %6, %cst {dimension_numbers = #tpu.dot_dimension_numbers<[1], [0], [0], [1], [0, 0, 1, 1], [], []>} : vector<8x64xf32>, vector<64x32xf32>, vector<8x32xf32> -> vector<8x32xf32>
    %8 = arith.mulf %7, %7 : vector<8x32xf32>
    %cst_3 = arith.constant dense<0.000000e+00> : vector<8xf32>
    %9 = vector.multi_reduction <add>, %8, %cst_3 [1] : vector<8x32xf32> to vector<8xf32>
    %10 = vector.shape_cast %9 : vector<8xf32> to vector<8x1xf32>
    %cst_4 = arith.constant 3.200000e+01 : f32
    %11 = vector.broadcast %cst_4 : f32 to vector<8x1xf32>
    %12 = arith.divf %10, %11 : vector<8x1xf32>
    %cst_5 = arith.constant 9.99999997E-7 : f32
    %13 = vector.broadcast %cst_5 : f32 to vector<8x1xf32>
    %14 = arith.addf %12, %13 : vector<8x1xf32>
    %15 = math.rsqrt %14 : vector<8x1xf32>
    %16 = vector.broadcast %15 : vector<8x1xf32> to vector<8x32xf32>
    %17 = arith.mulf %7, %16 : vector<8x32xf32>
    %c0_6 = arith.constant 0 : index
    %c0_7 = arith.constant 0 : index
    %18 = vector.load %arg3[%c0_6, %c0_7] : memref<1x32xf32, #tpu.memory_space<vmem>>, vector<1x32xf32>
    %19 = vector.broadcast %18 : vector<1x32xf32> to vector<8x32xf32>
    %20 = arith.addf %17, %19 : vector<8x32xf32>
    %c0_8 = arith.constant 0 : index
    %c0_9 = arith.constant 0 : index
    %21 = vector.load %arg5[%c0_8, %c0_9] : memref<32x32xf32, #tpu.memory_space<vmem>>, vector<32x32xf32>
    %c0_10 = arith.constant 0 : index
    %c0_11 = arith.constant 0 : index
    %22 = vector.load %arg6[%c0_10, %c0_11] : memref<32x32xf32, #tpu.memory_space<vmem>>, vector<32x32xf32>
    %c0_12 = arith.constant 0 : index
    %c0_13 = arith.constant 0 : index
    %23 = vector.load %arg7[%c0_12, %c0_13] : memref<32x32xf32, #tpu.memory_space<vmem>>, vector<32x32xf32>
    %c0_14 = arith.constant 0 : index
    %c0_15 = arith.constant 0 : index
    %24 = vector.load %arg8[%c0_14, %c0_15] : memref<32x32xf32, #tpu.memory_space<vmem>>, vector<32x32xf32>
    %c0_16 = arith.constant 0 : index
    %c0_17 = arith.constant 0 : index
    %25 = vector.load %arg9[%c0_16, %c0_17] : memref<8x32xf32, #tpu.memory_space<vmem>>, vector<8x32xf32>
    %c0_18 = arith.constant 0 : index
    %c0_19 = arith.constant 0 : index
    %c0_20 = arith.constant 0 : index
    %26 = vector.load %arg4[%c0_18, %c0_19, %c0_20] : memref<4x8x32xf32, #tpu.memory_space<vmem>>, vector<1x8x32xf32>
    %27 = vector.shape_cast %26 : vector<1x8x32xf32> to vector<8x32xf32>
    %c1 = arith.constant 1 : index
    %c0_21 = arith.constant 0 : index
    %c0_22 = arith.constant 0 : index
    %28 = vector.load %arg4[%c1, %c0_21, %c0_22] : memref<4x8x32xf32, #tpu.memory_space<vmem>>, vector<1x8x32xf32>
    %29 = vector.shape_cast %28 : vector<1x8x32xf32> to vector<8x32xf32>
    %c2 = arith.constant 2 : index
    %c0_23 = arith.constant 0 : index
    %c0_24 = arith.constant 0 : index
    %30 = vector.load %arg4[%c2, %c0_23, %c0_24] : memref<4x8x32xf32, #tpu.memory_space<vmem>>, vector<1x8x32xf32>
    %31 = vector.shape_cast %30 : vector<1x8x32xf32> to vector<8x32xf32>
    %c3 = arith.constant 3 : index
    %c0_25 = arith.constant 0 : index
    %c0_26 = arith.constant 0 : index
    %32 = vector.load %arg4[%c3, %c0_25, %c0_26] : memref<4x8x32xf32, #tpu.memory_space<vmem>>, vector<1x8x32xf32>
    %33 = vector.shape_cast %32 : vector<1x8x32xf32> to vector<8x32xf32>
    %c0_27 = arith.constant 0 : index
    %c0_28 = arith.constant 0 : index
    %34 = memref.load %arg0[%c0_27, %c0_28] : memref<3x1xf32, #tpu.memory_space<smem>>
    %35 = vector.broadcast %34 : f32 to vector<8x32xf32>
    %36 = arith.mulf %20, %35 : vector<8x32xf32>
    %37 = arith.mulf %36, %36 : vector<8x32xf32>
    %cst_29 = arith.constant dense<0.000000e+00> : vector<8xf32>
    %38 = vector.multi_reduction <add>, %37, %cst_29 [1] : vector<8x32xf32> to vector<8xf32>
    %39 = vector.shape_cast %38 : vector<8xf32> to vector<8x1xf32>
    %cst_30 = arith.constant 3.200000e+01 : f32
    %40 = vector.broadcast %cst_30 : f32 to vector<8x1xf32>
    %41 = arith.divf %39, %40 : vector<8x1xf32>
    %cst_31 = arith.constant 9.99999997E-7 : f32
    %42 = vector.broadcast %cst_31 : f32 to vector<8x1xf32>
    %43 = arith.addf %41, %42 : vector<8x1xf32>
    %44 = math.rsqrt %43 : vector<8x1xf32>
    %45 = vector.broadcast %44 : vector<8x1xf32> to vector<8x32xf32>
    %46 = arith.mulf %36, %45 : vector<8x32xf32>
    %c0_32 = arith.constant 0 : index
    %c0_33 = arith.constant 0 : index
    %c0_34 = arith.constant 0 : index
    %47 = vector.load %arg11[%c0_32, %c0_33, %c0_34] : memref<3x32x32xf32, #tpu.memory_space<vmem>>, vector<1x32x32xf32>
    %48 = vector.shape_cast %47 : vector<1x32x32xf32> to vector<32x32xf32>
    %cst_35 = arith.constant dense<0.000000e+00> : vector<8x32xf32>
    %49 = tpu.matmul %46, %48, %cst_35 {dimension_numbers = #tpu.dot_dimension_numbers<[1], [0], [0], [1], [0, 0, 1, 1], [], []>} : vector<8x32xf32>, vector<32x32xf32>, vector<8x32xf32> -> vector<8x32xf32>
    %c0_36 = arith.constant 0 : index
    %c0_37 = arith.constant 0 : index
    %c0_38 = arith.constant 0 : index
    %50 = vector.load %arg12[%c0_36, %c0_37, %c0_38] : memref<3x32x32xf32, #tpu.memory_space<vmem>>, vector<1x32x32xf32>
    %51 = vector.shape_cast %50 : vector<1x32x32xf32> to vector<32x32xf32>
    %cst_39 = arith.constant dense<0.000000e+00> : vector<8x32xf32>
    %52 = tpu.matmul %46, %51, %cst_39 {dimension_numbers = #tpu.dot_dimension_numbers<[1], [0], [0], [1], [0, 0, 1, 1], [], []>} : vector<8x32xf32>, vector<32x32xf32>, vector<8x32xf32> -> vector<8x32xf32>
    %c0_40 = arith.constant 0 : index
    %c0_41 = arith.constant 0 : index
    %c0_42 = arith.constant 0 : index
    %53 = vector.load %arg13[%c0_40, %c0_41, %c0_42] : memref<3x32x32xf32, #tpu.memory_space<vmem>>, vector<1x32x32xf32>
    %54 = vector.shape_cast %53 : vector<1x32x32xf32> to vector<32x32xf32>
    %cst_43 = arith.constant dense<0.000000e+00> : vector<8x32xf32>
    %55 = tpu.matmul %46, %54, %cst_43 {dimension_numbers = #tpu.dot_dimension_numbers<[1], [0], [0], [1], [0, 0, 1, 1], [], []>} : vector<8x32xf32>, vector<32x32xf32>, vector<8x32xf32> -> vector<8x32xf32>
    %56 = arith.mulf %49, %49 : vector<8x32xf32>
    %cst_44 = arith.constant dense<0.000000e+00> : vector<8x32xf32>
    %57 = tpu.matmul %56, %21, %cst_44 {dimension_numbers = #tpu.dot_dimension_numbers<[1], [0], [0], [1], [0, 0, 1, 1], [], []>} : vector<8x32xf32>, vector<32x32xf32>, vector<8x32xf32> -> vector<8x32xf32>
    %cst_45 = arith.constant 9.99999997E-7 : f32
    %58 = vector.broadcast %cst_45 : f32 to vector<8x32xf32>
    %59 = arith.addf %57, %58 : vector<8x32xf32>
    %60 = math.rsqrt %59 : vector<8x32xf32>
    %61 = arith.mulf %49, %60 : vector<8x32xf32>
    %62 = arith.mulf %52, %52 : vector<8x32xf32>
    %cst_46 = arith.constant dense<0.000000e+00> : vector<8x32xf32>
    %63 = tpu.matmul %62, %21, %cst_46 {dimension_numbers = #tpu.dot_dimension_numbers<[1], [0], [0], [1], [0, 0, 1, 1], [], []>} : vector<8x32xf32>, vector<32x32xf32>, vector<8x32xf32> -> vector<8x32xf32>
    %cst_47 = arith.constant 9.99999997E-7 : f32
    %64 = vector.broadcast %cst_47 : f32 to vector<8x32xf32>
    %65 = arith.addf %63, %64 : vector<8x32xf32>
    %66 = math.rsqrt %65 : vector<8x32xf32>
    %67 = arith.mulf %52, %66 : vector<8x32xf32>
    %68 = arith.mulf %61, %27 : vector<8x32xf32>
    %cst_48 = arith.constant dense<0.000000e+00> : vector<8x32xf32>
    %69 = tpu.matmul %61, %22, %cst_48 {dimension_numbers = #tpu.dot_dimension_numbers<[1], [0], [0], [1], [0, 0, 1, 1], [], []>} : vector<8x32xf32>, vector<32x32xf32>, vector<8x32xf32> -> vector<8x32xf32>
    %70 = arith.mulf %69, %29 : vector<8x32xf32>
    %71 = arith.addf %68, %70 : vector<8x32xf32>
    %72 = arith.mulf %67, %31 : vector<8x32xf32>
    %cst_49 = arith.constant dense<0.000000e+00> : vector<8x32xf32>
    %73 = tpu.matmul %67, %22, %cst_49 {dimension_numbers = #tpu.dot_dimension_numbers<[1], [0], [0], [1], [0, 0, 1, 1], [], []>} : vector<8x32xf32>, vector<32x32xf32>, vector<8x32xf32> -> vector<8x32xf32>
    %74 = arith.mulf %73, %33 : vector<8x32xf32>
    %75 = arith.addf %72, %74 : vector<8x32xf32>
    %76 = tpu.concatenate %75, %75, %75, %75 in 0 : vector<8x32xf32>, vector<8x32xf32>, vector<8x32xf32>, vector<8x32xf32> -> vector<32x32xf32>
    %77 = arith.mulf %76, %23 : vector<32x32xf32>
    %78 = tpu.concatenate %55, %55, %55, %55 in 0 : vector<8x32xf32>, vector<8x32xf32>, vector<8x32xf32>, vector<8x32xf32> -> vector<32x32xf32>
    %79 = arith.mulf %78, %23 : vector<32x32xf32>
    %cst_50 = arith.constant dense<0.000000e+00> : vector<8x32xf32>
    %80 = tpu.matmul %71, %77, %cst_50 {dimension_numbers = #tpu.dot_dimension_numbers<[1], [1], [0], [0], [0, 0, 1, 0], [], []>} : vector<8x32xf32>, vector<32x32xf32>, vector<8x32xf32> -> vector<8x32xf32>
    %81 = arith.addf %80, %25 : vector<8x32xf32>
    %82 = math.exp %81 : vector<8x32xf32>
    %cst_51 = arith.constant dense<0.000000e+00> : vector<8x32xf32>
    %83 = tpu.matmul %82, %24, %cst_51 {dimension_numbers = #tpu.dot_dimension_numbers<[1], [0], [0], [1], [0, 0, 1, 1], [], []>} : vector<8x32xf32>, vector<32x32xf32>, vector<8x32xf32> -> vector<8x32xf32>
    %84 = tpu.reciprocal %83 {approx = true} : vector<8x32xf32> -> vector<8x32xf32>
    %85 = arith.mulf %82, %84 : vector<8x32xf32>
    %cst_52 = arith.constant dense<0.000000e+00> : vector<8x32xf32>
    %86 = tpu.matmul %85, %79, %cst_52 {dimension_numbers = #tpu.dot_dimension_numbers<[1], [0], [0], [1], [0, 0, 1, 1], [], []>} : vector<8x32xf32>, vector<32x32xf32>, vector<8x32xf32> -> vector<8x32xf32>
    %c0_53 = arith.constant 0 : index
    %c0_54 = arith.constant 0 : index
    %c0_55 = arith.constant 0 : index
    %87 = vector.load %arg14[%c0_53, %c0_54, %c0_55] : memref<3x32x32xf32, #tpu.memory_space<vmem>>, vector<1x32x32xf32>
    %88 = vector.shape_cast %87 : vector<1x32x32xf32> to vector<32x32xf32>
    %cst_56 = arith.constant dense<0.000000e+00> : vector<8x32xf32>
    %89 = tpu.matmul %86, %88, %cst_56 {dimension_numbers = #tpu.dot_dimension_numbers<[1], [0], [0], [1], [0, 0, 1, 1], [], []>} : vector<8x32xf32>, vector<32x32xf32>, vector<8x32xf32> -> vector<8x32xf32>
    %90 = arith.addf %36, %89 : vector<8x32xf32>
    %91 = arith.mulf %90, %90 : vector<8x32xf32>
    %cst_57 = arith.constant dense<0.000000e+00> : vector<8xf32>
    %92 = vector.multi_reduction <add>, %91, %cst_57 [1] : vector<8x32xf32> to vector<8xf32>
    %93 = vector.shape_cast %92 : vector<8xf32> to vector<8x1xf32>
    %cst_58 = arith.constant 3.200000e+01 : f32
    %94 = vector.broadcast %cst_58 : f32 to vector<8x1xf32>
    %95 = arith.divf %93, %94 : vector<8x1xf32>
    %cst_59 = arith.constant 9.99999997E-7 : f32
    %96 = vector.broadcast %cst_59 : f32 to vector<8x1xf32>
    %97 = arith.addf %95, %96 : vector<8x1xf32>
    %98 = math.rsqrt %97 : vector<8x1xf32>
    %99 = vector.broadcast %98 : vector<8x1xf32> to vector<8x32xf32>
    %100 = arith.mulf %90, %99 : vector<8x32xf32>
    %c0_60 = arith.constant 0 : index
    %c0_61 = arith.constant 0 : index
    %c0_62 = arith.constant 0 : index
    %101 = vector.load %arg15[%c0_60, %c0_61, %c0_62] : memref<3x32x128xf32, #tpu.memory_space<vmem>>, vector<1x32x128xf32>
    %102 = vector.shape_cast %101 : vector<1x32x128xf32> to vector<32x128xf32>
    %cst_63 = arith.constant dense<0.000000e+00> : vector<8x128xf32>
    %103 = tpu.matmul %100, %102, %cst_63 {dimension_numbers = #tpu.dot_dimension_numbers<[1], [0], [0], [1], [0, 0, 1, 1], [], []>} : vector<8x32xf32>, vector<32x128xf32>, vector<8x128xf32> -> vector<8x128xf32>
    %cst_64 = arith.constant 0.000000e+00 : f32
    %104 = vector.broadcast %cst_64 : f32 to vector<8x128xf32>
    %105 = arith.maximumf %103, %104 : vector<8x128xf32>
    %c0_65 = arith.constant 0 : index
    %c0_66 = arith.constant 0 : index
    %c0_67 = arith.constant 0 : index
    %106 = vector.load %arg16[%c0_65, %c0_66, %c0_67] : memref<3x128x32xf32, #tpu.memory_space<vmem>>, vector<1x128x32xf32>
    %107 = vector.shape_cast %106 : vector<1x128x32xf32> to vector<128x32xf32>
    %cst_68 = arith.constant dense<0.000000e+00> : vector<8x32xf32>
    %108 = tpu.matmul %105, %107, %cst_68 {dimension_numbers = #tpu.dot_dimension_numbers<[1], [0], [0], [1], [0, 0, 1, 1], [], []>} : vector<8x128xf32>, vector<128x32xf32>, vector<8x32xf32> -> vector<8x32xf32>
    %109 = arith.addf %90, %108 : vector<8x32xf32>
    %c1_69 = arith.constant 1 : index
    %c0_70 = arith.constant 0 : index
    %110 = memref.load %arg0[%c1_69, %c0_70] : memref<3x1xf32, #tpu.memory_space<smem>>
    %111 = vector.broadcast %110 : f32 to vector<8x32xf32>
    %112 = arith.mulf %109, %111 : vector<8x32xf32>
    %113 = arith.mulf %112, %112 : vector<8x32xf32>
    %cst_71 = arith.constant dense<0.000000e+00> : vector<8xf32>
    %114 = vector.multi_reduction <add>, %113, %cst_71 [1] : vector<8x32xf32> to vector<8xf32>
    %115 = vector.shape_cast %114 : vector<8xf32> to vector<8x1xf32>
    %cst_72 = arith.constant 3.200000e+01 : f32
    %116 = vector.broadcast %cst_72 : f32 to vector<8x1xf32>
    %117 = arith.divf %115, %116 : vector<8x1xf32>
    %cst_73 = arith.constant 9.99999997E-7 : f32
    %118 = vector.broadcast %cst_73 : f32 to vector<8x1xf32>
    %119 = arith.addf %117, %118 : vector<8x1xf32>
    %120 = math.rsqrt %119 : vector<8x1xf32>
    %121 = vector.broadcast %120 : vector<8x1xf32> to vector<8x32xf32>
    %122 = arith.mulf %112, %121 : vector<8x32xf32>
    %c1_74 = arith.constant 1 : index
    %c0_75 = arith.constant 0 : index
    %c0_76 = arith.constant 0 : index
    %123 = vector.load %arg11[%c1_74, %c0_75, %c0_76] : memref<3x32x32xf32, #tpu.memory_space<vmem>>, vector<1x32x32xf32>
    %124 = vector.shape_cast %123 : vector<1x32x32xf32> to vector<32x32xf32>
    %cst_77 = arith.constant dense<0.000000e+00> : vector<8x32xf32>
    %125 = tpu.matmul %122, %124, %cst_77 {dimension_numbers = #tpu.dot_dimension_numbers<[1], [0], [0], [1], [0, 0, 1, 1], [], []>} : vector<8x32xf32>, vector<32x32xf32>, vector<8x32xf32> -> vector<8x32xf32>
    %c1_78 = arith.constant 1 : index
    %c0_79 = arith.constant 0 : index
    %c0_80 = arith.constant 0 : index
    %126 = vector.load %arg12[%c1_78, %c0_79, %c0_80] : memref<3x32x32xf32, #tpu.memory_space<vmem>>, vector<1x32x32xf32>
    %127 = vector.shape_cast %126 : vector<1x32x32xf32> to vector<32x32xf32>
    %cst_81 = arith.constant dense<0.000000e+00> : vector<8x32xf32>
    %128 = tpu.matmul %122, %127, %cst_81 {dimension_numbers = #tpu.dot_dimension_numbers<[1], [0], [0], [1], [0, 0, 1, 1], [], []>} : vector<8x32xf32>, vector<32x32xf32>, vector<8x32xf32> -> vector<8x32xf32>
    %c1_82 = arith.constant 1 : index
    %c0_83 = arith.constant 0 : index
    %c0_84 = arith.constant 0 : index
    %129 = vector.load %arg13[%c1_82, %c0_83, %c0_84] : memref<3x32x32xf32, #tpu.memory_space<vmem>>, vector<1x32x32xf32>
    %130 = vector.shape_cast %129 : vector<1x32x32xf32> to vector<32x32xf32>
    %cst_85 = arith.constant dense<0.000000e+00> : vector<8x32xf32>
    %131 = tpu.matmul %122, %130, %cst_85 {dimension_numbers = #tpu.dot_dimension_numbers<[1], [0], [0], [1], [0, 0, 1, 1], [], []>} : vector<8x32xf32>, vector<32x32xf32>, vector<8x32xf32> -> vector<8x32xf32>
    %132 = arith.mulf %125, %125 : vector<8x32xf32>
    %cst_86 = arith.constant dense<0.000000e+00> : vector<8x32xf32>
    %133 = tpu.matmul %132, %21, %cst_86 {dimension_numbers = #tpu.dot_dimension_numbers<[1], [0], [0], [1], [0, 0, 1, 1], [], []>} : vector<8x32xf32>, vector<32x32xf32>, vector<8x32xf32> -> vector<8x32xf32>
    %cst_87 = arith.constant 9.99999997E-7 : f32
    %134 = vector.broadcast %cst_87 : f32 to vector<8x32xf32>
    %135 = arith.addf %133, %134 : vector<8x32xf32>
    %136 = math.rsqrt %135 : vector<8x32xf32>
    %137 = arith.mulf %125, %136 : vector<8x32xf32>
    %138 = arith.mulf %128, %128 : vector<8x32xf32>
    %cst_88 = arith.constant dense<0.000000e+00> : vector<8x32xf32>
    %139 = tpu.matmul %138, %21, %cst_88 {dimension_numbers = #tpu.dot_dimension_numbers<[1], [0], [0], [1], [0, 0, 1, 1], [], []>} : vector<8x32xf32>, vector<32x32xf32>, vector<8x32xf32> -> vector<8x32xf32>
    %cst_89 = arith.constant 9.99999997E-7 : f32
    %140 = vector.broadcast %cst_89 : f32 to vector<8x32xf32>
    %141 = arith.addf %139, %140 : vector<8x32xf32>
    %142 = math.rsqrt %141 : vector<8x32xf32>
    %143 = arith.mulf %128, %142 : vector<8x32xf32>
    %144 = arith.mulf %137, %27 : vector<8x32xf32>
    %cst_90 = arith.constant dense<0.000000e+00> : vector<8x32xf32>
    %145 = tpu.matmul %137, %22, %cst_90 {dimension_numbers = #tpu.dot_dimension_numbers<[1], [0], [0], [1], [0, 0, 1, 1], [], []>} : vector<8x32xf32>, vector<32x32xf32>, vector<8x32xf32> -> vector<8x32xf32>
    %146 = arith.mulf %145, %29 : vector<8x32xf32>
    %147 = arith.addf %144, %146 : vector<8x32xf32>
    %148 = arith.mulf %143, %31 : vector<8x32xf32>
    %cst_91 = arith.constant dense<0.000000e+00> : vector<8x32xf32>
    %149 = tpu.matmul %143, %22, %cst_91 {dimension_numbers = #tpu.dot_dimension_numbers<[1], [0], [0], [1], [0, 0, 1, 1], [], []>} : vector<8x32xf32>, vector<32x32xf32>, vector<8x32xf32> -> vector<8x32xf32>
    %150 = arith.mulf %149, %33 : vector<8x32xf32>
    %151 = arith.addf %148, %150 : vector<8x32xf32>
    %152 = tpu.concatenate %151, %151, %151, %151 in 0 : vector<8x32xf32>, vector<8x32xf32>, vector<8x32xf32>, vector<8x32xf32> -> vector<32x32xf32>
    %153 = arith.mulf %152, %23 : vector<32x32xf32>
    %154 = tpu.concatenate %131, %131, %131, %131 in 0 : vector<8x32xf32>, vector<8x32xf32>, vector<8x32xf32>, vector<8x32xf32> -> vector<32x32xf32>
    %155 = arith.mulf %154, %23 : vector<32x32xf32>
    %cst_92 = arith.constant dense<0.000000e+00> : vector<8x32xf32>
    %156 = tpu.matmul %147, %153, %cst_92 {dimension_numbers = #tpu.dot_dimension_numbers<[1], [1], [0], [0], [0, 0, 1, 0], [], []>} : vector<8x32xf32>, vector<32x32xf32>, vector<8x32xf32> -> vector<8x32xf32>
    %157 = arith.addf %156, %25 : vector<8x32xf32>
    %158 = math.exp %157 : vector<8x32xf32>
    %cst_93 = arith.constant dense<0.000000e+00> : vector<8x32xf32>
    %159 = tpu.matmul %158, %24, %cst_93 {dimension_numbers = #tpu.dot_dimension_numbers<[1], [0], [0], [1], [0, 0, 1, 1], [], []>} : vector<8x32xf32>, vector<32x32xf32>, vector<8x32xf32> -> vector<8x32xf32>
    %160 = tpu.reciprocal %159 {approx = true} : vector<8x32xf32> -> vector<8x32xf32>
    %161 = arith.mulf %158, %160 : vector<8x32xf32>
    %cst_94 = arith.constant dense<0.000000e+00> : vector<8x32xf32>
    %162 = tpu.matmul %161, %155, %cst_94 {dimension_numbers = #tpu.dot_dimension_numbers<[1], [0], [0], [1], [0, 0, 1, 1], [], []>} : vector<8x32xf32>, vector<32x32xf32>, vector<8x32xf32> -> vector<8x32xf32>
    %c1_95 = arith.constant 1 : index
    %c0_96 = arith.constant 0 : index
    %c0_97 = arith.constant 0 : index
    %163 = vector.load %arg14[%c1_95, %c0_96, %c0_97] : memref<3x32x32xf32, #tpu.memory_space<vmem>>, vector<1x32x32xf32>
    %164 = vector.shape_cast %163 : vector<1x32x32xf32> to vector<32x32xf32>
    %cst_98 = arith.constant dense<0.000000e+00> : vector<8x32xf32>
    %165 = tpu.matmul %162, %164, %cst_98 {dimension_numbers = #tpu.dot_dimension_numbers<[1], [0], [0], [1], [0, 0, 1, 1], [], []>} : vector<8x32xf32>, vector<32x32xf32>, vector<8x32xf32> -> vector<8x32xf32>
    %166 = arith.addf %112, %165 : vector<8x32xf32>
    %167 = arith.mulf %166, %166 : vector<8x32xf32>
    %cst_99 = arith.constant dense<0.000000e+00> : vector<8xf32>
    %168 = vector.multi_reduction <add>, %167, %cst_99 [1] : vector<8x32xf32> to vector<8xf32>
    %169 = vector.shape_cast %168 : vector<8xf32> to vector<8x1xf32>
    %cst_100 = arith.constant 3.200000e+01 : f32
    %170 = vector.broadcast %cst_100 : f32 to vector<8x1xf32>
    %171 = arith.divf %169, %170 : vector<8x1xf32>
    %cst_101 = arith.constant 9.99999997E-7 : f32
    %172 = vector.broadcast %cst_101 : f32 to vector<8x1xf32>
    %173 = arith.addf %171, %172 : vector<8x1xf32>
    %174 = math.rsqrt %173 : vector<8x1xf32>
    %175 = vector.broadcast %174 : vector<8x1xf32> to vector<8x32xf32>
    %176 = arith.mulf %166, %175 : vector<8x32xf32>
    %c1_102 = arith.constant 1 : index
    %c0_103 = arith.constant 0 : index
    %c0_104 = arith.constant 0 : index
    %177 = vector.load %arg15[%c1_102, %c0_103, %c0_104] : memref<3x32x128xf32, #tpu.memory_space<vmem>>, vector<1x32x128xf32>
    %178 = vector.shape_cast %177 : vector<1x32x128xf32> to vector<32x128xf32>
    %cst_105 = arith.constant dense<0.000000e+00> : vector<8x128xf32>
    %179 = tpu.matmul %176, %178, %cst_105 {dimension_numbers = #tpu.dot_dimension_numbers<[1], [0], [0], [1], [0, 0, 1, 1], [], []>} : vector<8x32xf32>, vector<32x128xf32>, vector<8x128xf32> -> vector<8x128xf32>
    %cst_106 = arith.constant 0.000000e+00 : f32
    %180 = vector.broadcast %cst_106 : f32 to vector<8x128xf32>
    %181 = arith.maximumf %179, %180 : vector<8x128xf32>
    %c1_107 = arith.constant 1 : index
    %c0_108 = arith.constant 0 : index
    %c0_109 = arith.constant 0 : index
    %182 = vector.load %arg16[%c1_107, %c0_108, %c0_109] : memref<3x128x32xf32, #tpu.memory_space<vmem>>, vector<1x128x32xf32>
    %183 = vector.shape_cast %182 : vector<1x128x32xf32> to vector<128x32xf32>
    %cst_110 = arith.constant dense<0.000000e+00> : vector<8x32xf32>
    %184 = tpu.matmul %181, %183, %cst_110 {dimension_numbers = #tpu.dot_dimension_numbers<[1], [0], [0], [1], [0, 0, 1, 1], [], []>} : vector<8x128xf32>, vector<128x32xf32>, vector<8x32xf32> -> vector<8x32xf32>
    %185 = arith.addf %166, %184 : vector<8x32xf32>
    %c2_111 = arith.constant 2 : index
    %c0_112 = arith.constant 0 : index
    %186 = memref.load %arg0[%c2_111, %c0_112] : memref<3x1xf32, #tpu.memory_space<smem>>
    %187 = vector.broadcast %186 : f32 to vector<8x32xf32>
    %188 = arith.mulf %185, %187 : vector<8x32xf32>
    %189 = arith.mulf %188, %188 : vector<8x32xf32>
    %cst_113 = arith.constant dense<0.000000e+00> : vector<8xf32>
    %190 = vector.multi_reduction <add>, %189, %cst_113 [1] : vector<8x32xf32> to vector<8xf32>
    %191 = vector.shape_cast %190 : vector<8xf32> to vector<8x1xf32>
    %cst_114 = arith.constant 3.200000e+01 : f32
    %192 = vector.broadcast %cst_114 : f32 to vector<8x1xf32>
    %193 = arith.divf %191, %192 : vector<8x1xf32>
    %cst_115 = arith.constant 9.99999997E-7 : f32
    %194 = vector.broadcast %cst_115 : f32 to vector<8x1xf32>
    %195 = arith.addf %193, %194 : vector<8x1xf32>
    %196 = math.rsqrt %195 : vector<8x1xf32>
    %197 = vector.broadcast %196 : vector<8x1xf32> to vector<8x32xf32>
    %198 = arith.mulf %188, %197 : vector<8x32xf32>
    %c2_116 = arith.constant 2 : index
    %c0_117 = arith.constant 0 : index
    %c0_118 = arith.constant 0 : index
    %199 = vector.load %arg11[%c2_116, %c0_117, %c0_118] : memref<3x32x32xf32, #tpu.memory_space<vmem>>, vector<1x32x32xf32>
    %200 = vector.shape_cast %199 : vector<1x32x32xf32> to vector<32x32xf32>
    %cst_119 = arith.constant dense<0.000000e+00> : vector<8x32xf32>
    %201 = tpu.matmul %198, %200, %cst_119 {dimension_numbers = #tpu.dot_dimension_numbers<[1], [0], [0], [1], [0, 0, 1, 1], [], []>} : vector<8x32xf32>, vector<32x32xf32>, vector<8x32xf32> -> vector<8x32xf32>
    %c2_120 = arith.constant 2 : index
    %c0_121 = arith.constant 0 : index
    %c0_122 = arith.constant 0 : index
    %202 = vector.load %arg12[%c2_120, %c0_121, %c0_122] : memref<3x32x32xf32, #tpu.memory_space<vmem>>, vector<1x32x32xf32>
    %203 = vector.shape_cast %202 : vector<1x32x32xf32> to vector<32x32xf32>
    %cst_123 = arith.constant dense<0.000000e+00> : vector<8x32xf32>
    %204 = tpu.matmul %198, %203, %cst_123 {dimension_numbers = #tpu.dot_dimension_numbers<[1], [0], [0], [1], [0, 0, 1, 1], [], []>} : vector<8x32xf32>, vector<32x32xf32>, vector<8x32xf32> -> vector<8x32xf32>
    %c2_124 = arith.constant 2 : index
    %c0_125 = arith.constant 0 : index
    %c0_126 = arith.constant 0 : index
    %205 = vector.load %arg13[%c2_124, %c0_125, %c0_126] : memref<3x32x32xf32, #tpu.memory_space<vmem>>, vector<1x32x32xf32>
    %206 = vector.shape_cast %205 : vector<1x32x32xf32> to vector<32x32xf32>
    %cst_127 = arith.constant dense<0.000000e+00> : vector<8x32xf32>
    %207 = tpu.matmul %198, %206, %cst_127 {dimension_numbers = #tpu.dot_dimension_numbers<[1], [0], [0], [1], [0, 0, 1, 1], [], []>} : vector<8x32xf32>, vector<32x32xf32>, vector<8x32xf32> -> vector<8x32xf32>
    %208 = arith.mulf %201, %201 : vector<8x32xf32>
    %cst_128 = arith.constant dense<0.000000e+00> : vector<8x32xf32>
    %209 = tpu.matmul %208, %21, %cst_128 {dimension_numbers = #tpu.dot_dimension_numbers<[1], [0], [0], [1], [0, 0, 1, 1], [], []>} : vector<8x32xf32>, vector<32x32xf32>, vector<8x32xf32> -> vector<8x32xf32>
    %cst_129 = arith.constant 9.99999997E-7 : f32
    %210 = vector.broadcast %cst_129 : f32 to vector<8x32xf32>
    %211 = arith.addf %209, %210 : vector<8x32xf32>
    %212 = math.rsqrt %211 : vector<8x32xf32>
    %213 = arith.mulf %201, %212 : vector<8x32xf32>
    %214 = arith.mulf %204, %204 : vector<8x32xf32>
    %cst_130 = arith.constant dense<0.000000e+00> : vector<8x32xf32>
    %215 = tpu.matmul %214, %21, %cst_130 {dimension_numbers = #tpu.dot_dimension_numbers<[1], [0], [0], [1], [0, 0, 1, 1], [], []>} : vector<8x32xf32>, vector<32x32xf32>, vector<8x32xf32> -> vector<8x32xf32>
    %cst_131 = arith.constant 9.99999997E-7 : f32
    %216 = vector.broadcast %cst_131 : f32 to vector<8x32xf32>
    %217 = arith.addf %215, %216 : vector<8x32xf32>
    %218 = math.rsqrt %217 : vector<8x32xf32>
    %219 = arith.mulf %204, %218 : vector<8x32xf32>
    %220 = arith.mulf %213, %27 : vector<8x32xf32>
    %cst_132 = arith.constant dense<0.000000e+00> : vector<8x32xf32>
    %221 = tpu.matmul %213, %22, %cst_132 {dimension_numbers = #tpu.dot_dimension_numbers<[1], [0], [0], [1], [0, 0, 1, 1], [], []>} : vector<8x32xf32>, vector<32x32xf32>, vector<8x32xf32> -> vector<8x32xf32>
    %222 = arith.mulf %221, %29 : vector<8x32xf32>
    %223 = arith.addf %220, %222 : vector<8x32xf32>
    %224 = arith.mulf %219, %31 : vector<8x32xf32>
    %cst_133 = arith.constant dense<0.000000e+00> : vector<8x32xf32>
    %225 = tpu.matmul %219, %22, %cst_133 {dimension_numbers = #tpu.dot_dimension_numbers<[1], [0], [0], [1], [0, 0, 1, 1], [], []>} : vector<8x32xf32>, vector<32x32xf32>, vector<8x32xf32> -> vector<8x32xf32>
    %226 = arith.mulf %225, %33 : vector<8x32xf32>
    %227 = arith.addf %224, %226 : vector<8x32xf32>
    %228 = tpu.concatenate %227, %227, %227, %227 in 0 : vector<8x32xf32>, vector<8x32xf32>, vector<8x32xf32>, vector<8x32xf32> -> vector<32x32xf32>
    %229 = arith.mulf %228, %23 : vector<32x32xf32>
    %230 = tpu.concatenate %207, %207, %207, %207 in 0 : vector<8x32xf32>, vector<8x32xf32>, vector<8x32xf32>, vector<8x32xf32> -> vector<32x32xf32>
    %231 = arith.mulf %230, %23 : vector<32x32xf32>
    %cst_134 = arith.constant dense<0.000000e+00> : vector<8x32xf32>
    %232 = tpu.matmul %223, %229, %cst_134 {dimension_numbers = #tpu.dot_dimension_numbers<[1], [1], [0], [0], [0, 0, 1, 0], [], []>} : vector<8x32xf32>, vector<32x32xf32>, vector<8x32xf32> -> vector<8x32xf32>
    %233 = arith.addf %232, %25 : vector<8x32xf32>
    %234 = math.exp %233 : vector<8x32xf32>
    %cst_135 = arith.constant dense<0.000000e+00> : vector<8x32xf32>
    %235 = tpu.matmul %234, %24, %cst_135 {dimension_numbers = #tpu.dot_dimension_numbers<[1], [0], [0], [1], [0, 0, 1, 1], [], []>} : vector<8x32xf32>, vector<32x32xf32>, vector<8x32xf32> -> vector<8x32xf32>
    %236 = tpu.reciprocal %235 {approx = true} : vector<8x32xf32> -> vector<8x32xf32>
    %237 = arith.mulf %234, %236 : vector<8x32xf32>
    %cst_136 = arith.constant dense<0.000000e+00> : vector<8x32xf32>
    %238 = tpu.matmul %237, %231, %cst_136 {dimension_numbers = #tpu.dot_dimension_numbers<[1], [0], [0], [1], [0, 0, 1, 1], [], []>} : vector<8x32xf32>, vector<32x32xf32>, vector<8x32xf32> -> vector<8x32xf32>
    %c2_137 = arith.constant 2 : index
    %c0_138 = arith.constant 0 : index
    %c0_139 = arith.constant 0 : index
    %239 = vector.load %arg14[%c2_137, %c0_138, %c0_139] : memref<3x32x32xf32, #tpu.memory_space<vmem>>, vector<1x32x32xf32>
    %240 = vector.shape_cast %239 : vector<1x32x32xf32> to vector<32x32xf32>
    %cst_140 = arith.constant dense<0.000000e+00> : vector<8x32xf32>
    %241 = tpu.matmul %238, %240, %cst_140 {dimension_numbers = #tpu.dot_dimension_numbers<[1], [0], [0], [1], [0, 0, 1, 1], [], []>} : vector<8x32xf32>, vector<32x32xf32>, vector<8x32xf32> -> vector<8x32xf32>
    %242 = arith.addf %188, %241 : vector<8x32xf32>
    %243 = arith.mulf %242, %242 : vector<8x32xf32>
    %cst_141 = arith.constant dense<0.000000e+00> : vector<8xf32>
    %244 = vector.multi_reduction <add>, %243, %cst_141 [1] : vector<8x32xf32> to vector<8xf32>
    %245 = vector.shape_cast %244 : vector<8xf32> to vector<8x1xf32>
    %cst_142 = arith.constant 3.200000e+01 : f32
    %246 = vector.broadcast %cst_142 : f32 to vector<8x1xf32>
    %247 = arith.divf %245, %246 : vector<8x1xf32>
    %cst_143 = arith.constant 9.99999997E-7 : f32
    %248 = vector.broadcast %cst_143 : f32 to vector<8x1xf32>
    %249 = arith.addf %247, %248 : vector<8x1xf32>
    %250 = math.rsqrt %249 : vector<8x1xf32>
    %251 = vector.broadcast %250 : vector<8x1xf32> to vector<8x32xf32>
    %252 = arith.mulf %242, %251 : vector<8x32xf32>
    %c2_144 = arith.constant 2 : index
    %c0_145 = arith.constant 0 : index
    %c0_146 = arith.constant 0 : index
    %253 = vector.load %arg15[%c2_144, %c0_145, %c0_146] : memref<3x32x128xf32, #tpu.memory_space<vmem>>, vector<1x32x128xf32>
    %254 = vector.shape_cast %253 : vector<1x32x128xf32> to vector<32x128xf32>
    %cst_147 = arith.constant dense<0.000000e+00> : vector<8x128xf32>
    %255 = tpu.matmul %252, %254, %cst_147 {dimension_numbers = #tpu.dot_dimension_numbers<[1], [0], [0], [1], [0, 0, 1, 1], [], []>} : vector<8x32xf32>, vector<32x128xf32>, vector<8x128xf32> -> vector<8x128xf32>
    %cst_148 = arith.constant 0.000000e+00 : f32
    %256 = vector.broadcast %cst_148 : f32 to vector<8x128xf32>
    %257 = arith.maximumf %255, %256 : vector<8x128xf32>
    %c2_149 = arith.constant 2 : index
    %c0_150 = arith.constant 0 : index
    %c0_151 = arith.constant 0 : index
    %258 = vector.load %arg16[%c2_149, %c0_150, %c0_151] : memref<3x128x32xf32, #tpu.memory_space<vmem>>, vector<1x128x32xf32>
    %259 = vector.shape_cast %258 : vector<1x128x32xf32> to vector<128x32xf32>
    %cst_152 = arith.constant dense<0.000000e+00> : vector<8x32xf32>
    %260 = tpu.matmul %257, %259, %cst_152 {dimension_numbers = #tpu.dot_dimension_numbers<[1], [0], [0], [1], [0, 0, 1, 1], [], []>} : vector<8x128xf32>, vector<128x32xf32>, vector<8x32xf32> -> vector<8x32xf32>
    %261 = arith.addf %242, %260 : vector<8x32xf32>
    %262 = arith.mulf %261, %261 : vector<8x32xf32>
    %cst_153 = arith.constant dense<0.000000e+00> : vector<8xf32>
    %263 = vector.multi_reduction <add>, %262, %cst_153 [1] : vector<8x32xf32> to vector<8xf32>
    %264 = vector.shape_cast %263 : vector<8xf32> to vector<8x1xf32>
    %cst_154 = arith.constant 3.200000e+01 : f32
    %265 = vector.broadcast %cst_154 : f32 to vector<8x1xf32>
    %266 = arith.divf %264, %265 : vector<8x1xf32>
    %cst_155 = arith.constant 9.99999997E-7 : f32
    %267 = vector.broadcast %cst_155 : f32 to vector<8x1xf32>
    %268 = arith.addf %266, %267 : vector<8x1xf32>
    %269 = math.rsqrt %268 : vector<8x1xf32>
    %270 = vector.broadcast %269 : vector<8x1xf32> to vector<8x32xf32>
    %271 = arith.mulf %261, %270 : vector<8x32xf32>
    %c0_156 = arith.constant 0 : index
    %c0_157 = arith.constant 0 : index
    %272 = vector.load %arg10[%c0_156, %c0_157] : memref<32x128xf32, #tpu.memory_space<vmem>>, vector<32x128xf32>
    %cst_158 = arith.constant dense<0.000000e+00> : vector<8x128xf32>
    %273 = tpu.matmul %271, %272, %cst_158 {dimension_numbers = #tpu.dot_dimension_numbers<[1], [0], [0], [1], [0, 0, 1, 1], [], []>} : vector<8x32xf32>, vector<32x128xf32>, vector<8x128xf32> -> vector<8x128xf32>
    %cst_159 = arith.constant 0.0235702265 : f32
    %274 = vector.broadcast %cst_159 : f32 to vector<8x128xf32>
    %275 = arith.mulf %273, %274 : vector<8x128xf32>
    %cst_160 = arith.constant 0.000000e+00 : f32
    %276 = vector.broadcast %cst_160 : f32 to vector<8x128xf32>
    %277 = arith.subf %276, %275 : vector<8x128xf32>
    %278 = math.exp %277 : vector<8x128xf32>
    %cst_161 = arith.constant 1.000000e+00 : f32
    %279 = vector.broadcast %cst_161 : f32 to vector<8x128xf32>
    %280 = arith.addf %279, %278 : vector<8x128xf32>
    %cst_162 = arith.constant 3.000000e+01 : f32
    %281 = vector.broadcast %cst_162 : f32 to vector<8x128xf32>
    %282 = arith.divf %281, %280 : vector<8x128xf32>
    %c0_163 = arith.constant 0 : index
    %c0_164 = arith.constant 0 : index
    %283 = vector.load %arg17[%c0_163, %c0_164] : memref<8x128xf32, #tpu.memory_space<vmem>>, vector<8x128xf32>
    tpu.vector_store %arg17[%c0_163, %c0_164], %282 {strides = array<i32>} : memref<8x128xf32, #tpu.memory_space<vmem>>, vector<8x128xf32>,
    return
  }
}

</mosaic_0001>

<bundles_post_ra>
// kernel: tpu_custom_call.1
= control target key start
LH: loop header
LB: loop body
LE: loop exit
PB: predicated region body
PF: predicated region fallthrough
CT: control target
= control target key end

     0   :  { %s5659_s0 = inlined_call_operand.vmem [shape: f32[3,1], index: 0, kind: input, shape index: {}]   ;;  %s5660_s1 = inlined_call_operand.vmem [shape: s32[8,1], index: 1, kind: input, shape index: {}]   ;;  %s5661_s2 = inlined_call_operand.vmem [shape: f32[64,32], index: 2, kind: input, shape index: {}]   ;;  %s5662_s3 = inlined_call_operand.vmem [shape: f32[1,32], index: 3, kind: input, shape index: {}]   ;;  %s5663_s4 = inlined_call_operand.vmem [shape: f32[4,8,32], index: 4, kind: input, shape index: {}]   ;;  %s5664_s5 = inlined_call_operand.hbm [shape: f32[32,32], index: 5, kind: input, shape index: {}]   ;;  %s5665_s6 = inlined_call_operand.hbm [shape: f32[32,32], index: 6, kind: input, shape index: {}]   ;;  %s5666_s7 = inlined_call_operand.hbm [shape: f32[32,32], index: 7, kind: input, shape index: {}]   ;;  %s5667_s8 = inlined_call_operand.hbm [shape: f32[32,32], index: 8, kind: input, shape index: {}]   ;;  %s5668_s9 = inlined_call_operand.vmem [shape: f32[8,32], index: 9, kind: input, shape index: {}]   ;;  %s5669_s10 = inlined_call_operand.hbm [shape: f32[32,128], index: 10, kind: input, shape index: {}]   ;;  %s5670_s11 = inlined_call_operand.vmem [shape: f32[3,32,32], index: 11, kind: input, shape index: {}]   ;;  %s5671_s12 = inlined_call_operand.vmem [shape: f32[3,32,32], index: 12, kind: input, shape index: {}]   ;;  %s5672_s13 = inlined_call_operand.vmem [shape: f32[3,32,32], index: 13, kind: input, shape index: {}]   ;;  %s5673_s14 = inlined_call_operand.vmem [shape: f32[3,32,32], index: 14, kind: input, shape index: {}]   ;;  %s5674_s15 = inlined_call_operand.vmem [shape: f32[3,32,128], index: 15, kind: input, shape index: {}]   ;;  %s5675_s16 = inlined_call_operand.vmem [shape: f32[3,128,32], index: 16, kind: input, shape index: {}]   ;;  %s5676_s17 = inlined_call_operand.hbm [shape: f32[8,128], index: 17, kind: output, shape index: {}]  }
   0x1   :  { %5677 = sst [smem:[#allocation19_spill]] %s5659_s0 }
   0x2   :  { %5678 = sst [smem:[#allocation20_spill]] %s5660_s1 }
   0x3   :  { %22 = vsyncpa [#allocation5], 0 }
   0x4   :  { %23 = vsyncpa [#allocation3], 0 }
   0x5   :  { %24 = vsyncpa [#allocation8], 0 }
   0x6   :  { %25 = vsyncpa [#allocation11], 0 }
   0x7   :  { %26 = vsyncpa [#allocation4], 0  ;;  %s4621_s24 = smov [#allocation7]   ;;  %s4622_s26 = smov [#allocation10]  }
   0x8   :  { %s62_s25 = sshll.u32 %s4621_s24, 4  ;;  %s86_s27 = sshll.u32 %s4622_s26, 4  ;;  %s63_s25 = int_to_ptr.vmem [resolvable:$true] %s62_s25  ;;  %s87_s27 = int_to_ptr.vmem [resolvable:$true] %s86_s27 }
   0x9   :  { %s4487_s28 = scalar_lea.vmem %s63_s25, 512  ;;  %p4492_p1 = scmp.lt.s32.totalorder %s63_s25, %s63_s25 }
   0xa   :  { %p4488_p0 = scmp.ne.s32.totalorder %s63_s25, %s4487_s28  ;;  %p4493_p2 = scmp.lt.s32.totalorder %s4487_s28, %s4487_s28 }
   0xc   :  { %p4494_p3 = por %p4493_p2, %p4492_p1 }
   0xe   :  { %p4495_p4 = pnand %p4494_p3, %p4488_p0 }
  0x10   :  { %4498 = shalt.err (!%p4495_p4)
}
  0x11   :  { %s4623_s29 = smov 128   ;;  %s4624_s0 = smov 8  }
  0x12   :  { %68 = dma.hbm_to_vmem [thread:$0]  %s5665_s6, 512, %s63_s25, [#allocation8], %s4623_s29, %s4623_s29, %s4624_s0  }
  0x13   :  { %s4507_s19 = scalar_lea.vmem %s87_s27, 512  ;;  %p4512_p6 = scmp.lt.s32.totalorder %s87_s27, %s87_s27 }
  0x14   :  { %p4508_p5 = scmp.ne.s32.totalorder %s87_s27, %s4507_s19  ;;  %p4513_p7 = scmp.lt.s32.totalorder %s4507_s19, %s4507_s19 }
  0x16   :  { %p4514_p8 = por %p4513_p7, %p4512_p6 }
  0x18   :  { %p4515_p9 = pnand %p4514_p8, %p4508_p5 }
  0x1a   :  { %4518 = shalt.err (!%p4515_p9)
}
  0x1b   :  { %92 = dma.hbm_to_vmem [thread:$0]  %s5667_s8, 512, %s87_s27, [#allocation11], %s4623_s29, %s4623_s29, %s4624_s0  }
  0x1c   :  { %s5679_s23 = sld [smem:[#allocation19_spill]] }
  0x22   :  { %s33_s24 = sshll.u32 %s5679_s23, 4  ;;  %s34_s24 = int_to_ptr.vmem [resolvable:$true] %s33_s24 }
  0x23   :  { %s4519_s6 = scalar_lea.vmem %s34_s24, 64  ;;  %p4524_p11 = scmp.lt.s32.totalorder %s34_s24, %s34_s24 }
  0x24   :  { %p4520_p10 = scmp.ne.s32.totalorder %s34_s24, %s4519_s6  ;;  %p4525_p12 = scmp.lt.s32.totalorder %s4519_s6, %s4519_s6 }
  0x26   :  { %p4526_p13 = por %p4525_p12, %p4524_p11 }
  0x28   :  { %p4527_p0 = pnand %p4526_p13, %p4520_p10 }
  0x2a   :  { %4530 = shalt.err (!%p4527_p0)
}
  0x2b   :  { %s4625_s25 = smov [#allocation2]   ;;  %s4626_s26 = smov [#allocation6]  }
  0x2c   :  { %36 = dma.vmem_to_smem %s34_s24, 64, %s4625_s25, [#allocation5]  }
  0x2d   :  { %s50_s28 = sshll.u32 %s4626_s26, 4  ;;  %s4627_s30 = smov [#allocation9]   ;;  %s51_s28 = int_to_ptr.vmem [resolvable:$true] %s50_s28 }
  0x2e   :  { %s74_s18 = sshll.u32 %s4627_s30, 4  ;;  %s4539_s8 = scalar_lea.vmem %s51_s28, 512  ;;  %s75_s18 = int_to_ptr.vmem [resolvable:$true] %s74_s18 }
  0x2f   :  { %p4540_p1 = scmp.ne.s32.totalorder %s51_s28, %s4539_s8  ;;  %p4544_p2 = scmp.lt.s32.totalorder %s51_s28, %s51_s28 }
  0x30   :  { %p4545_p3 = scmp.lt.s32.totalorder %s4539_s8, %s4539_s8 }
  0x32   :  { %p4546_p4 = por %p4545_p3, %p4544_p2 }
  0x34   :  { %p4547_p5 = pnand %p4546_p4, %p4540_p1 }
  0x36   :  { %4550 = shalt.err (!%p4547_p5)
}
  0x37   :  { %56 = dma.hbm_to_vmem [thread:$0]  %s5664_s5, 512, %s51_s28, [#allocation3], %s4623_s29, %s4623_s29, %s4624_s0  }
  0x38   :  { %s4559_s1 = scalar_lea.vmem %s75_s18, 512  ;;  %p4564_p7 = scmp.lt.s32.totalorder %s75_s18, %s75_s18 }
  0x39   :  { %p4560_p6 = scmp.ne.s32.totalorder %s75_s18, %s4559_s1  ;;  %p4565_p8 = scmp.lt.s32.totalorder %s4559_s1, %s4559_s1 }
  0x3b   :  { %p4566_p9 = por %p4565_p8, %p4564_p7 }
  0x3d   :  { %p4567_p10 = pnand %p4566_p9, %p4560_p6 }
  0x3f   :  { %4570 = shalt.err (!%p4567_p10)
}
  0x40   :  { %80 = dma.hbm_to_vmem [thread:$0]  %s5666_s7, 512, %s75_s18, [#allocation8], %s4623_s29, %s4623_s29, %s4624_s0  }
  0x41   :  { %s4628_s22 = smov [#allocation12]  }
  0x42   :  { %s100_s23 = sshll.u32 %s4628_s22, 4  ;;  %s101_s23 = int_to_ptr.vmem [resolvable:$true] %s100_s23 }
  0x43   :  { %s4579_s24 = scalar_lea.vmem %s101_s23, 512  ;;  %p4584_p12 = scmp.lt.s32.totalorder %s101_s23, %s101_s23 }
  0x44   :  { %p4580_p11 = scmp.ne.s32.totalorder %s101_s23, %s4579_s24  ;;  %p4585_p13 = scmp.lt.s32.totalorder %s4579_s24, %s4579_s24 }
  0x46   :  { %p4586_p0 = por %p4585_p13, %p4584_p12 }
  0x48   :  { %p4587_p1 = pnand %p4586_p0, %p4580_p11 }
  0x4a   :  { %4590 = shalt.err (!%p4587_p1)
}
  0x4b   :  { %106 = dma.hbm_to_vmem [thread:$0]  %s5669_s10, 512, %s101_s23, [#allocation11], %s4623_s29, %s4623_s29, %s4624_s0  }
  0x4c   :  { %4611 = dma.done.wait [#allocation5], 64  }
  0x4d   :  { %4612 = vsyncadd [#allocation5], 4294967232 }
  0x4e   :  { %4613 = dma.done.wait [#allocation3], 512  }
  0x4f   :  { %4614 = vsyncadd [#allocation3], 4294966784 }
  0x50   :  { %4615 = dma.done.wait [#allocation8], 1024  }
  0x51   :  { %4616 = vsyncadd [#allocation8], 4294966272 }
  0x52   :  { %4617 = dma.done.wait [#allocation11], 1024  }
  0x53   :  { %4618 = vsyncadd [#allocation11], 4294966272 }
  0x54   :  { %137 = sfence }
  0x55   :  { %s5680_s26 = sld [smem:[#allocation20_spill]]  ;;  %v154_v1 = vld [vmem:[%s5661_s2 + $0x38] sm:$0xff]  ;;  %v4629_v2 = vmov 0   ;;  %v4630_v3 = vmov 0.0   ;;  %v153_v4 = vld [vmem:[%s5661_s2 + $0x30] sm:$0xff]  ;;  %v152_v5 = vld [vmem:[%s5661_s2 + $0x28] sm:$0xff]  ;;  %v139_v11 = vlaneseq }
  0x56   :  { %4413 = vset.pattern.permute.xlu0 %v4629_v2  ;;  %3870 = vmatprep.subr.mxu0 %v4630_v3  ;;  %vm4631_vm0 = vmmov 0   ;;  %v151_v6 = vld [vmem:[%s5661_s2 + $0x20] sm:$0xff]  ;;  %v150_v7 = vld [vmem:[%s5661_s2 + $0x18] sm:$0xff]  ;;  %v149_v8 = vld [vmem:[%s5661_s2 + $0x10] sm:$0xff]  ;;  %vm155_vm1 = vcmask 523264   ;;  %vm230_vm3 = vcmask 261120  }
  0x57   :  { %3871 = vmatpush3.msra.mxu0 %v154_v1  ;;  %3886 = vmatprep.mubr.msk.f32.mxu0 %vm4631_vm0, %v4630_v3  ;;  %v148_v9 = vld [vmem:[%s5661_s2 + $0x8] sm:$0xff]  ;;  %v147_v10 = vld [vmem:[%s5661_s2] sm:$0xff]  ;;  %v140_v12 = vand.u32 127, %v139_v11  ;;  %s271_s2 = sld [smem:[#allocation2]]  ;;  %v285_v30 = vld [vmem:[%s5670_s11 + $0x18] sm:$0xff] }
  0x58   :  { %3872 = vmatprep.subr.mxu0 %v4630_v3  ;;  %3900 = vmatprep.subr.mxu1 %v4630_v3  ;;  %v3498_v23 = vld [vmem:[%s5662_s3] ss:$0 sm:$0xff]  ;;  %v362_v31 = vld [vmem:[%s5671_s12 + $0x18] sm:$0xff]  ;;  %v284_v32 = vld [vmem:[%s5670_s11 + $0x10] sm:$0xff]  ;;  %s3518_s23 = sld [smem:[#allocation2 + $0x80]] }
  0x59   :  { %3873 = vmatpush3.msra.mxu0 %v153_v4  ;;  %3908 = vmatprep.mubr.msk.f32.mxu1 %vm4631_vm0, %v4630_v3  ;;  %v361_v33 = vld [vmem:[%s5671_s12 + $0x10] sm:$0xff]  ;;  %v283_v34 = vld [vmem:[%s5670_s11 + $0x8] sm:$0xff]  ;;  %v282_v36 = vld [vmem:[%s5670_s11] sm:$0xff] }
  0x5a   :  { %3874 = vmatprep.subr.mxu0 %v4630_v3  ;;  %3901 = vmatpush3.msra.mxu1 %v362_v31  ;;  %v360_v35 = vld [vmem:[%s5671_s12 + $0x8] sm:$0xff]  ;;  %v359_v37 = vld [vmem:[%s5671_s12] sm:$0xff]  ;;  %v436_v43 = vld [vmem:[%s5672_s13 + $0x18] sm:$0xff] }
  0x5b   :  { %v138_v0 = vld [vmem:[%s5680_s26] sm:$0xff]  ;;  %3875 = vmatpush3.msra.mxu0 %v152_v5  ;;  %3902 = vmatprep.subr.mxu1 %v4630_v3  ;;  %v4845_v44 = vld [vmem:[#allocation6 + $0x18] sm:$0xff]  ;;  %v435_v45 = vld [vmem:[%s5672_s13 + $0x10] sm:$0xff]  ;;  %s3571_s26 = sld [smem:[#allocation2 + $0x100]] }
  0x5c   :  { %142 = vperm.xlu0 %4413, %v138_v0   ;;  %3876 = vmatprep.subr.mxu0 %v4630_v3  ;;  %v4854_v46 = vld [vmem:[#allocation6 + $0x10] sm:$0xff]  ;;  %v434_v47 = vld [vmem:[%s5672_s13 + $0x8] sm:$0xff]  ;;  %v433_v48 = vld [vmem:[%s5672_s13] sm:$0xff] }
  0x5d   :  { %3877 = vmatpush3.msra.mxu0 %v151_v6  ;;  %v272_v25 = vstv %s271_s2  ;;  %3903 = vmatpush3.msra.mxu1 %v361_v33  ;;  %v4879_v49 = vld [vmem:[#allocation6 + $0x8] sm:$0xff]  ;;  %v4885_v50 = vld [vmem:[#allocation6] sm:$0xff]  ;;  %v4899_v59 = vld [vmem:[#allocation7 + $0x18] sm:$0xff] }
  0x5e   :  { %3878 = vmatprep.subr.mxu0 %v4630_v3  ;;  %3904 = vmatprep.subr.mxu1 %v4630_v3  ;;  %v4901_v60 = vld [vmem:[#allocation7 + $0x10] sm:$0xff]  ;;  %v4907_v61 = vld [vmem:[#allocation7 + $0x8] sm:$0xff]  ;;  %v4913_v62 = vld [vmem:[#allocation7] sm:$0xff] }
  0x5f   :  { %3879 = vmatpush3.msra.mxu0 %v150_v7  ;;  %3905 = vmatpush3.msra.mxu1 %v360_v35  ;;  %v4937_v11 = vld [vmem:[%s5663_s4 + $0x18] sm:$0xff]  ;;  %v4982_v35 = vld [vmem:[#allocation10 + $0x8] sm:$0xff] }
  0x60   :  { %3880 = vmatprep.subr.mxu0 %v4630_v3  ;;  %3906 = vmatprep.subr.mxu1 %v4630_v3  ;;  %v4976_v33 = vld [vmem:[#allocation10 + $0x18] sm:$0xff] }
  0x61   :  { %3881 = vmatpush3.msra.mxu0 %v149_v8  ;;  %3907 = vmatpush3.msra.mxu1 %v359_v37  ;;  %v4995_v37 = vld [vmem:[%s5668_s9] sm:$0xff] }
  0x62   :  { %3882 = vmatprep.subr.mxu0 %v4630_v3  ;;  %3922 = vmatprep.subr.mxu1 %v4630_v3 }
  0x63   :  { %3883 = vmatpush3.msra.mxu0 %v148_v9 }
  0x64   :  { %3884 = vmatprep.subr.mxu0 %v4630_v3 }
  0x65   :  { %3885 = vmatpush3.msra.mxu0 %v147_v10  ;;  %v4932_v10 = vld [vmem:[%s5663_s4 + $0x10] sm:$0xff] }
  0x66   :  { %3889 = vmatprep.subr.mxu0 %v4630_v3 }
  0xd7   :  { %v143_v13 = vpop.permute.xlu0 %142 }
  0xd8   :  { %vm144_vm2 = vcmp.eq.s32.totalorder %v143_v13, %v140_v12 }
  0xd9   :  { %v3496_v14 = vsel %vm144_vm2, 1.0, %v4630_v3 }
  0xda   :  { %3887 = vmatmul.mubr.msk.f32.vlgmr.msra.gmra.mxu0 %vm155_vm1, %v3496_v14 }
  0xdb   :  { %3897 = vmatprep.mubr.msk.f32.mxu0 %vm4631_vm0, %v4630_v3  ;;  %3890 = vmatpush3.msra.mxu0 %v285_v30 }
  0xdc   :  { %3891 = vmatprep.subr.mxu0 %v4630_v3 }
  0xdd   :  { %3892 = vmatpush3.msra.mxu0 %v284_v32 }
  0xde   :  { %3893 = vmatprep.subr.mxu0 %v4630_v3 }
  0xdf   :  { %3894 = vmatpush3.msra.mxu0 %v283_v34  ;;  %v4978_v34 = vld [vmem:[#allocation10 + $0x10] sm:$0xff] }
  0xe0   :  { %3895 = vmatprep.subr.mxu0 %v4630_v3 }
  0xe1   :  { %3896 = vmatpush3.msra.mxu0 %v282_v36  ;;  %v4986_v36 = vld [vmem:[#allocation10] sm:$0xff] }
  0xe2   :  { %3911 = vmatprep.subr.mxu0 %v4630_v3 }
 0x19a   :  { %v225_v15 = vpop.f32.mrf.mxu0 }
 0x19b   :  { %v229_v16 = vmul.f32 %v225_v15, %v225_v15 }
 0x19c   :  { %v3888_v17 = vpop.f32.mrf.mxu0 }
 0x19d   :  { %v231_v18 = vsel %vm230_vm3, %v229_v16, 0.0 }
 0x19e   :  { %232 = vadd.xlane.f32.xlu0 %v231_v18 }
 0x227   :  { %v233_v19 = vpop.xlane.xlu0 %232 }
 0x228   :  { %v235_v20 = vmul.f32 0.03125, %v233_v19  ;;  %v4941_v19 = vld [vmem:[#allocation9 + $0x18] sm:$0xff] }
 0x22a   :  { %v236_v21 = vadd.f32 1e-06, %v235_v20 }
 0x22c   :  { %4414 = vrsqrt.f32 %v236_v21  ;;  %v4945_v21 = vld [vmem:[#allocation9 + $0x10] sm:$0xff] }
 0x239   :  { %v4415_v22 = vpop.eup %4414 }
 0x23a   :  { %v238_v24 = vmul.f32 %v4415_v22, %v225_v15 }
 0x23c   :  { %v246_v26 = vadd.f32 %v3498_v23, %v238_v24  ;;  %v4950_v23 = vld [vmem:[#allocation9 + $0x8] sm:$0xff] }
 0x23d   :  { %v4956_v24 = vld [vmem:[%s5663_s4 + $0x8] sm:$0xff] }
 0x23e   :  { %v4804_v27 = vmul.f32 %v272_v25, %v246_v26  ;;  %v4962_v26 = vld [vmem:[%s5663_s4] sm:$0xff] }
 0x240   :  { %v274_v28 = vmul.f32 %v4804_v27, %v4804_v27 }
 0x242   :  { %v275_v29 = vsel %vm230_vm3, %v274_v28, 0.0  ;;  %v4965_v28 = vld [vmem:[#allocation9] sm:$0xff] }
 0x243   :  { %276 = vadd.xlane.f32.xlu1 %v275_v29 }
 0x2cc   :  { %v277_v38 = vpop.xlane.xlu1 %276 }
 0x2cd   :  { %v278_v39 = vmul.f32 0.03125, %v277_v38 }
 0x2cf   :  { %v279_v40 = vadd.f32 1e-06, %v278_v39 }
 0x2d1   :  { %4416 = vrsqrt.f32 %v279_v40 }
 0x2de   :  { %v4417_v41 = vpop.eup %4416 }
 0x2df   :  { %v281_v42 = vmul.f32 %v4417_v41, %v4804_v27 }
 0x2e1   :  { %3898 = vmatmul.mubr.msk.f32.vlgmr.msra.gmra.mxu0 %vm230_vm3, %v281_v42  ;;  %3909 = vmatmul.mubr.msk.f32.vlgmr.msra.gmra.mxu1 %vm230_vm3, %v281_v42 }
 0x2e2   :  { %3912 = vmatpush3.msra.mxu0 %v436_v43  ;;  %3919 = vmatprep.mubr.msk.f32.mxu0 %vm4631_vm0, %v4630_v3 }
 0x2e3   :  { %3913 = vmatprep.subr.mxu0 %v4630_v3  ;;  %3923 = vmatpush3.msra.mxu1 %v4845_v44 }
 0x2e4   :  { %3914 = vmatpush3.msra.mxu0 %v435_v45  ;;  %3924 = vmatprep.subr.mxu1 %v4630_v3 }
 0x2e5   :  { %3915 = vmatprep.subr.mxu0 %v4630_v3  ;;  %3925 = vmatpush3.msra.mxu1 %v4854_v46 }
 0x2e6   :  { %3916 = vmatpush3.msra.mxu0 %v434_v47  ;;  %3926 = vmatprep.subr.mxu1 %v4630_v3 }
 0x2e7   :  { %3917 = vmatprep.subr.mxu0 %v4630_v3  ;;  %3930 = vmatprep.mubr.msk.f32.mxu1 %vm4631_vm0, %v4630_v3 }
 0x2e8   :  { %3918 = vmatpush3.msra.mxu0 %v433_v48  ;;  %3927 = vmatpush3.msra.mxu1 %v4879_v49 }
 0x2e9   :  { %3920 = vmatmul.mubr.msk.f32.vlgmr.msra.gmra.mxu0 %vm230_vm3, %v281_v42  ;;  %3933 = vmatprep.subr.mxu0 %v4630_v3 }
 0x2ea   :  { %3934 = vmatpush3.msra.mxu0 %v4845_v44  ;;  %3941 = vmatprep.mubr.msk.f32.mxu0 %vm4631_vm0, %v4630_v3 }
 0x2eb   :  { %3935 = vmatprep.subr.mxu0 %v4630_v3  ;;  %3928 = vmatprep.subr.mxu1 %v4630_v3 }
 0x2ec   :  { %3936 = vmatpush3.msra.mxu0 %v4854_v46  ;;  %3929 = vmatpush3.msra.mxu1 %v4885_v50 }
 0x2ed   :  { %3937 = vmatprep.subr.mxu0 %v4630_v3  ;;  %3944 = vmatprep.subr.mxu1 %v4630_v3 }
 0x2ee   :  { %3938 = vmatpush3.msra.mxu0 %v4879_v49 }
 0x2ef   :  { %3939 = vmatprep.subr.mxu0 %v4630_v3 }
 0x2f0   :  { %3940 = vmatpush3.msra.mxu0 %v4885_v50 }
 0x2f1   :  { %3955 = vmatprep.subr.mxu0 %v4630_v3 }
 0x3a1   :  { %v355_v51 = vpop.f32.mrf.mxu0  ;;  %v429_v52 = vpop.f32.mrf.mxu1 }
 0x3a2   :  { %v507_v53 = vmul.f32 %v355_v51, %v355_v51  ;;  %v583_v54 = vmul.f32 %v429_v52, %v429_v52 }
 0x3a3   :  { %v3899_v55 = vpop.f32.mrf.mxu0  ;;  %v3910_v56 = vpop.f32.mrf.mxu1 }
 0x3a4   :  { %3931 = vmatmul.mubr.msk.f32.vlgmr.msra.gmra.mxu1 %vm230_vm3, %v507_v53  ;;  %3942 = vmatmul.mubr.msk.f32.vlgmr.msra.gmra.mxu0 %vm230_vm3, %v583_v54  ;;  %v1055_v53 = vld [vmem:[%s5673_s14 + $0x8] sm:$0xff] }
 0x3a5   :  { %3952 = vmatprep.mubr.msk.f32.mxu1 %vm4631_vm0, %v4630_v3  ;;  %3963 = vmatprep.mubr.msk.f32.mxu0 %vm4631_vm0, %v4630_v3 }
 0x3a6   :  { %3945 = vmatpush3.msra.mxu1 %v4899_v59  ;;  %3956 = vmatpush3.msra.mxu0 %v4899_v59 }
 0x3a7   :  { %3946 = vmatprep.subr.mxu1 %v4630_v3  ;;  %3957 = vmatprep.subr.mxu0 %v4630_v3 }
 0x3a8   :  { %3947 = vmatpush3.msra.mxu1 %v4901_v60  ;;  %3958 = vmatpush3.msra.mxu0 %v4901_v60 }
 0x3a9   :  { %v4897_v57 = vpop.f32.mrf.mxu0  ;;  %3948 = vmatprep.subr.mxu1 %v4630_v3  ;;  %3959 = vmatprep.subr.mxu0 %v4630_v3 }
 0x3aa   :  { %3949 = vmatpush3.msra.mxu1 %v4907_v61  ;;  %3960 = vmatpush3.msra.mxu0 %v4907_v61  ;;  %v818_v43 = vmul.f32 %v4897_v57, %v4941_v19  ;;  %v817_v45 = vmul.f32 %v4897_v57, %v4945_v21  ;;  %v816_v47 = vmul.f32 %v4897_v57, %v4950_v23 }
 0x3ab   :  { %v3921_v58 = vpop.f32.mrf.mxu0  ;;  %3950 = vmatprep.subr.mxu1 %v4630_v3  ;;  %3961 = vmatprep.subr.mxu0 %v4630_v3  ;;  %v815_v48 = vmul.f32 %v4897_v57, %v4965_v28 }
 0x3ac   :  { %3951 = vmatpush3.msra.mxu1 %v4913_v62  ;;  %3962 = vmatpush3.msra.mxu0 %v4913_v62  ;;  %v1054_v58 = vld [vmem:[%s5673_s14] sm:$0xff] }
 0x3ad   :  { %3966 = vmatprep.subr.mxu1 %v4630_v3  ;;  %3977 = vmatprep.subr.mxu0 %v4630_v3 }
 0x464   :  { %v577_v63 = vpop.f32.mrf.mxu1  ;;  %v653_v0 = vpop.f32.mrf.mxu0 }
 0x465   :  { %v578_v1 = vadd.f32 1e-06, %v577_v63  ;;  %v654_v2 = vadd.f32 1e-06, %v653_v0 }
 0x466   :  { %v3932_v4 = vpop.f32.mrf.mxu1  ;;  %v3943_v5 = vpop.f32.mrf.mxu0 }
 0x467   :  { %4418 = vrsqrt.f32 %v578_v1 }
 0x468   :  { %4420 = vrsqrt.f32 %v654_v2 }
 0x474   :  { %v4419_v6 = vpop.eup %4418 }
 0x475   :  { %v4421_v7 = vpop.eup %4420  ;;  %v582_v8 = vmul.f32 %v4419_v6, %v355_v51  ;;  %v1057_v51 = vld [vmem:[%s5673_s14 + $0x18] sm:$0xff] }
 0x476   :  { %v658_v9 = vmul.f32 %v4421_v7, %v429_v52  ;;  %v1056_v52 = vld [vmem:[%s5673_s14 + $0x10] sm:$0xff]  ;;  %v1143_v7 = vld [vmem:[%s5674_s15 + $0x18] sm:$0xff] }
 0x477   :  { %3953 = vmatmul.mubr.msk.f32.vlgmr.msra.gmra.mxu1 %vm230_vm3, %v582_v8  ;;  %v659_v31 = vmul.f32 %v582_v8, %v4962_v26  ;;  %v1142_v8 = vld [vmem:[%s5674_s15 + $0x10] sm:$0xff] }
 0x478   :  { %3964 = vmatmul.mubr.msk.f32.vlgmr.msra.gmra.mxu0 %vm230_vm3, %v658_v9  ;;  %3974 = vmatprep.mubr.msk.f32.mxu1 %vm4631_vm0, %v4630_v3  ;;  %v735_v14 = vmul.f32 %v4932_v10, %v658_v9  ;;  %v1140_v9 = vld [vmem:[%s5674_s15] sm:$0xff] }
 0x479   :  { %3985 = vmatprep.mubr.msk.f32.mxu0 %vm4631_vm0, %v4630_v3  ;;  %3978 = vmatpush3.msra.mxu0 %v4976_v33 }
 0x47a   :  { %3979 = vmatprep.subr.mxu0 %v4630_v3 }
 0x47b   :  { %3980 = vmatpush3.msra.mxu0 %v4978_v34 }
 0x47c   :  { %3981 = vmatprep.subr.mxu0 %v4630_v3 }
 0x47d   :  { %3982 = vmatpush3.msra.mxu0 %v4982_v35 }
 0x47e   :  { %3983 = vmatprep.subr.mxu0 %v4630_v3 }
 0x47f   :  { %3984 = vmatpush3.msra.mxu0 %v4986_v36 }
 0x480   :  { %3988 = vmatprep.subr.mxu0 %v4630_v3 }
 0x537   :  { %v729_v12 = vpop.f32.mrf.mxu1 }
 0x538   :  { %v805_v13 = vpop.f32.mrf.mxu0  ;;  %v733_v29 = vmul.f32 %v4956_v24, %v729_v12  ;;  %v1233_v12 = vld [vmem:[%s5675_s16 + $0x78] sm:$0xff] }
 0x539   :  { %v809_v15 = vmul.f32 %v4937_v11, %v805_v13  ;;  %v3954_v16 = vpop.f32.mrf.mxu1  ;;  %v1232_v13 = vld [vmem:[%s5675_s16 + $0x70] sm:$0xff] }
 0x53a   :  { %v3965_v17 = vpop.f32.mrf.mxu0  ;;  %v734_v32 = vadd.f32 %v733_v29, %v659_v31  ;;  %v1229_v16 = vld [vmem:[%s5675_s16 + $0x58] sm:$0xff]  ;;  %v1223_v29 = vld [vmem:[%s5675_s16 + $0x28] sm:$0xff] }
 0x53b   :  { %v810_v18 = vadd.f32 %v809_v15, %v735_v14  ;;  %v1231_v14 = vld [vmem:[%s5675_s16 + $0x68] sm:$0xff]  ;;  %v1230_v15 = vld [vmem:[%s5675_s16 + $0x60] sm:$0xff]  ;;  %v1228_v17 = vld [vmem:[%s5675_s16 + $0x50] sm:$0xff] }
 0x53c   :  { %v1221_v31 = vld [vmem:[%s5675_s16 + $0x18] sm:$0xff] }
 0x53d   :  { %v814_v20 = vmul.f32 %v810_v18, %v4941_v19  ;;  %v813_v22 = vmul.f32 %v810_v18, %v4945_v21  ;;  %v812_v25 = vmul.f32 %v810_v18, %v4950_v23  ;;  %v811_v30 = vmul.f32 %v810_v18, %v4965_v28  ;;  %v1227_v18 = vld [vmem:[%s5675_s16 + $0x48] sm:$0xff] }
 0x53f   :  { %3967 = vmatpush3.xpose.msk.msra.mxu1 %vm230_vm3, %v814_v20  ;;  %v1226_v20 = vld [vmem:[%s5675_s16 + $0x40] sm:$0xff] }
 0x540   :  { %3968 = vmatprep.subr.mxu1 %v4630_v3 }
 0x543   :  { %3969 = vmatpush3.xpose.msk.msra.mxu1 %vm230_vm3, %v813_v22  ;;  %v1225_v22 = vld [vmem:[%s5675_s16 + $0x38] sm:$0xff] }
 0x544   :  { %3970 = vmatprep.subr.mxu1 %v4630_v3 }
 0x547   :  { %3971 = vmatpush3.xpose.msk.msra.mxu1 %vm230_vm3, %v812_v25  ;;  %v1224_v25 = vld [vmem:[%s5675_s16 + $0x30] sm:$0xff] }
 0x548   :  { %3972 = vmatprep.subr.mxu1 %v4630_v3 }
 0x54b   :  { %3973 = vmatpush3.xpose.msk.msra.mxu1 %vm230_vm3, %v811_v30  ;;  %v1222_v30 = vld [vmem:[%s5675_s16 + $0x20] sm:$0xff] }
 0x54c   :  { %3999 = vmatprep.subr.mxu1 %v4630_v3 }
 0x54e   :  { %3975 = vmatmul.mubr.msk.f32.vlgmr.msra.gmra.mxu1 %vm230_vm3, %v734_v32  ;;  %v1220_v32 = vld [vmem:[%s5675_s16 + $0x10] sm:$0xff] }
 0x54f   :  { %4007 = vmatprep.mubr.msk.f32.mxu1 %vm4631_vm0, %v4630_v3  ;;  %4000 = vmatpush3.msra.mxu1 %v1057_v51 }
 0x550   :  { %4001 = vmatprep.subr.mxu1 %v4630_v3 }
 0x551   :  { %4002 = vmatpush3.msra.mxu1 %v1056_v52 }
 0x552   :  { %4003 = vmatprep.subr.mxu1 %v4630_v3 }
 0x553   :  { %4004 = vmatpush3.msra.mxu1 %v1055_v53  ;;  %v1306_v53 = vstv %s3518_s23 }
 0x554   :  { %4005 = vmatprep.subr.mxu1 %v4630_v3 }
 0x555   :  { %4006 = vmatpush3.msra.mxu1 %v1054_v58 }
 0x556   :  { %4021 = vmatprep.subr.mxu1 %v4630_v3 }
 0x60e   :  { %v900_v38 = vpop.f32.mrf.mxu1 }
 0x60f   :  { %v901_v39 = vadd.f32 %v900_v38, %v4995_v37 }
 0x610   :  { %v3976_v40 = vpop.f32.mrf.mxu1 }
 0x611   :  { %v904_v41 = vmul.f32 1.442695, %v901_v39 }
 0x613   :  { %4422 = vpow2.f32 %v904_v41 }
 0x620   :  { %v4423_v42 = vpop.eup %4422 }
 0x621   :  { %3986 = vmatmul.mubr.msk.f32.vlgmr.msra.gmra.mxu0 %vm230_vm3, %v4423_v42 }
 0x622   :  { %3989 = vmatpush3.msra.mxu0 %v818_v43  ;;  %3996 = vmatprep.mubr.msk.f32.mxu0 %vm4631_vm0, %v4630_v3  ;;  %v1219_v43 = vld [vmem:[%s5675_s16 + $0x8] sm:$0xff] }
 0x623   :  { %3990 = vmatprep.subr.mxu0 %v4630_v3 }
 0x624   :  { %3991 = vmatpush3.msra.mxu0 %v817_v45  ;;  %v1218_v45 = vld [vmem:[%s5675_s16] sm:$0xff] }
 0x625   :  { %3992 = vmatprep.subr.mxu0 %v4630_v3 }
 0x626   :  { %3993 = vmatpush3.msra.mxu0 %v816_v47 }
 0x627   :  { %3994 = vmatprep.subr.mxu0 %v4630_v3 }
 0x628   :  { %3995 = vmatpush3.msra.mxu0 %v815_v48 }
 0x629   :  { %4010 = vmatprep.subr.mxu0 %v4630_v3 }
 0x6e1   :  { %v975_v54 = vpop.f32.mrf.mxu0 }
 0x6e2   :  { %4424 = vrcp.f32 %v975_v54 }
 0x6e3   :  { %v3987_v55 = vpop.f32.mrf.mxu0 }
 0x6ef   :  { %v4425_v56 = vpop.eup %4424 }
 0x6f0   :  { %v980_v57 = vmul.f32 %v4425_v56, %v4423_v42 }
 0x6f2   :  { %3997 = vmatmul.mubr.msk.f32.vlgmr.msra.gmra.mxu0 %vm230_vm3, %v980_v57 }
 0x6f3   :  { %4018 = vmatprep.mubr.msk.f32.mxu0 %vm4631_vm0, %v4630_v3  ;;  %4011 = vmatpush3.msra.mxu0 %v1143_v7 }
 0x6f4   :  { %4012 = vmatprep.subr.mxu0 %v4630_v3 }
 0x6f5   :  { %4013 = vmatpush3.msra.mxu0 %v1142_v8 }
 0x6f6   :  { %4014 = vmatprep.subr.mxu0 %v4630_v3 }
 0x7b2   :  { %v1050_v63 = vpop.f32.mrf.mxu0 }
 0x7b3   :  { %4008 = vmatmul.mubr.msk.f32.vlgmr.msra.gmra.mxu1 %vm230_vm3, %v1050_v63  ;;  %v3522_v63 = vld [vmem:[%s5670_s11 + $0x38] sm:$0xff] }
 0x7b4   :  { %v3998_v0 = vpop.f32.mrf.mxu0  ;;  %4053 = vmatprep.mubr.msk.f32.mxu1 %vm4631_vm0, %v4630_v3  ;;  %4022 = vmatpush3.msra.mxu1 %v1233_v12  ;;  %v3525_v12 = vld [vmem:[%s5671_s12 + $0x28] sm:$0xff] }
 0x7b5   :  { %4023 = vmatprep.subr.mxu1 %v4630_v3  ;;  %v3521_v0 = vld [vmem:[%s5670_s11 + $0x30] sm:$0xff] }
 0x7b6   :  { %4024 = vmatpush3.msra.mxu1 %v1232_v13  ;;  %v3524_v13 = vld [vmem:[%s5671_s12 + $0x20] sm:$0xff] }
 0x7b7   :  { %4025 = vmatprep.subr.mxu1 %v4630_v3 }
 0x7b8   :  { %4026 = vmatpush3.msra.mxu1 %v1231_v14  ;;  %v3532_v14 = vld [vmem:[%s5672_s13 + $0x38] sm:$0xff] }
 0x7b9   :  { %4027 = vmatprep.subr.mxu1 %v4630_v3 }
 0x7ba   :  { %4028 = vmatpush3.msra.mxu1 %v1230_v15  ;;  %v3531_v15 = vld [vmem:[%s5672_s13 + $0x30] sm:$0xff] }
 0x7bb   :  { %4029 = vmatprep.subr.mxu1 %v4630_v3 }
 0x7bc   :  { %4030 = vmatpush3.msra.mxu1 %v1229_v16  ;;  %v3530_v16 = vld [vmem:[%s5672_s13 + $0x28] sm:$0xff] }
 0x7bd   :  { %4031 = vmatprep.subr.mxu1 %v4630_v3 }
 0x7be   :  { %4032 = vmatpush3.msra.mxu1 %v1228_v17  ;;  %v3529_v17 = vld [vmem:[%s5672_s13 + $0x20] sm:$0xff] }
 0x7bf   :  { %4033 = vmatprep.subr.mxu1 %v4630_v3 }
 0x7c0   :  { %4034 = vmatpush3.msra.mxu1 %v1227_v18 }
 0x7c1   :  { %4035 = vmatprep.subr.mxu1 %v4630_v3 }
 0x7c2   :  { %4036 = vmatpush3.msra.mxu1 %v1226_v20 }
 0x7c3   :  { %4037 = vmatprep.subr.mxu1 %v4630_v3 }
 0x7c4   :  { %4038 = vmatpush3.msra.mxu1 %v1225_v22 }
 0x7c5   :  { %4039 = vmatprep.subr.mxu1 %v4630_v3 }
 0x7c6   :  { %4040 = vmatpush3.msra.mxu1 %v1224_v25 }
 0x7c7   :  { %4041 = vmatprep.subr.mxu1 %v4630_v3 }
 0x7c8   :  { %4042 = vmatpush3.msra.mxu1 %v1223_v29 }
 0x7c9   :  { %4043 = vmatprep.subr.mxu1 %v4630_v3 }
 0x7ca   :  { %4044 = vmatpush3.msra.mxu1 %v1222_v30 }
 0x7cb   :  { %4045 = vmatprep.subr.mxu1 %v4630_v3 }
 0x7cc   :  { %4046 = vmatpush3.msra.mxu1 %v1221_v31 }
 0x7cd   :  { %4047 = vmatprep.subr.mxu1 %v4630_v3 }
 0x7ce   :  { %4048 = vmatpush3.msra.mxu1 %v1220_v32 }
 0x7cf   :  { %4049 = vmatprep.subr.mxu1 %v4630_v3 }
 0x7d0   :  { %4050 = vmatpush3.msra.mxu1 %v1219_v43 }
 0x7d1   :  { %4051 = vmatprep.subr.mxu1 %v4630_v3 }
 0x7d2   :  { %4052 = vmatpush3.msra.mxu1 %v1218_v45 }
 0x7d3   :  { %4100 = vmatprep.subr.mxu1 %v4630_v3 }
 0x873   :  { %v1127_v1 = vpop.f32.mrf.mxu1 }
 0x874   :  { %v5036_v2 = vadd.f32 %v1127_v1, %v4804_v27  ;;  %v1141_v27 = vld [vmem:[%s5674_s15 + $0x8] sm:$0xff] }
 0x875   :  { %v4009_v4 = vpop.f32.mrf.mxu1  ;;  %4015 = vmatpush3.msra.mxu0 %v1141_v27  ;;  %v3520_v1 = vld [vmem:[%s5670_s11 + $0x28] sm:$0xff]  ;;  %v3527_v27 = vld [vmem:[%s5671_s12 + $0x38] sm:$0xff] }
 0x876   :  { %v1132_v5 = vmul.f32 %v5036_v2, %v5036_v2  ;;  %4016 = vmatprep.subr.mxu0 %v4630_v3 }
 0x877   :  { %4017 = vmatpush3.msra.mxu0 %v1140_v9  ;;  %v3526_v9 = vld [vmem:[%s5671_s12 + $0x30] sm:$0xff] }
 0x878   :  { %v1133_v6 = vsel %vm230_vm3, %v1132_v5, 0.0  ;;  %4056 = vmatprep.subr.mxu0 %v4630_v3 }
 0x879   :  { %1134 = vadd.xlane.f32.xlu1 %v1133_v6 }
 0x902   :  { %v1135_v38 = vpop.xlane.xlu1 %1134 }
 0x903   :  { %v1136_v39 = vmul.f32 0.03125, %v1135_v38 }
 0x905   :  { %v1137_v40 = vadd.f32 1e-06, %v1136_v39 }
 0x907   :  { %4426 = vrsqrt.f32 %v1137_v40 }
 0x914   :  { %v4427_v41 = vpop.eup %4426 }
 0x915   :  { %v1139_v42 = vmul.f32 %v4427_v41, %v5036_v2 }
 0x917   :  { %4019 = vmatmul.mubr.msk.f32.vlgmr.msra.gmra.mxu0 %vm230_vm3, %v1139_v42 }
 0x918   :  { %4064 = vmatprep.mubr.msk.f32.mxu0 %vm4631_vm0, %v4630_v3  ;;  %4057 = vmatpush3.msra.mxu0 %v3522_v63 }
 0x919   :  { %4058 = vmatprep.subr.mxu0 %v4630_v3 }
 0x91a   :  { %4059 = vmatpush3.msra.mxu0 %v3521_v0 }
 0x91b   :  { %4060 = vmatprep.subr.mxu0 %v4630_v3 }
 0x91c   :  { %4061 = vmatpush3.msra.mxu0 %v3520_v1 }
 0x91d   :  { %4062 = vmatprep.subr.mxu0 %v4630_v3 }
 0x9d7   :  { %v1213_v47 = vpop.f32.mrf.mxu0 }
 0x9d8   :  { %v1217_v48 = vmax.f32 %v1213_v47, 0.0 }
 0x9d9   :  { %v4020_v51 = vpop.f32.mrf.mxu0 }
 0x9da   :  { %4054 = vmatmul.mubr.f32.vlgmr.msra.gmra.mxu1 %v1217_v48 }
 0x9db   :  { %4101 = vmatpush3.msra.mxu1 %v4845_v44  ;;  %4108 = vmatprep.mubr.msk.f32.mxu1 %vm4631_vm0, %v4630_v3 }
 0x9dc   :  { %4102 = vmatprep.subr.mxu1 %v4630_v3 }
 0x9dd   :  { %4103 = vmatpush3.msra.mxu1 %v4854_v46 }
 0x9de   :  { %4104 = vmatprep.subr.mxu1 %v4630_v3 }
 0x9df   :  { %4105 = vmatpush3.msra.mxu1 %v4879_v49 }
 0x9e0   :  { %4106 = vmatprep.subr.mxu1 %v4630_v3 }
 0x9e1   :  { %4107 = vmatpush3.msra.mxu1 %v4885_v50 }
 0x9e2   :  { %4122 = vmatprep.subr.mxu1 %v4630_v3 }
 0xa9a   :  { %v1300_v52 = vpop.f32.mrf.mxu1 }
 0xa9b   :  { %v1304_v54 = vadd.f32 %v1300_v52, %v5036_v2  ;;  %v3519_v2 = vld [vmem:[%s5670_s11 + $0x20] sm:$0xff] }
 0xa9c   :  { %v4055_v55 = vpop.f32.mrf.mxu1  ;;  %4063 = vmatpush3.msra.mxu0 %v3519_v2 }
 0xa9d   :  { %v5136_v56 = vmul.f32 %v1306_v53, %v1304_v54  ;;  %4067 = vmatprep.subr.mxu0 %v4630_v3 }
 0xa9f   :  { %v1308_v57 = vmul.f32 %v5136_v56, %v5136_v56 }
 0xaa1   :  { %v1309_v58 = vsel %vm230_vm3, %v1308_v57, 0.0 }
 0xaa2   :  { %1310 = vadd.xlane.f32.xlu1 %v1309_v58 }
 0xb2b   :  { %v1311_v4 = vpop.xlane.xlu1 %1310 }
 0xb2c   :  { %v1312_v5 = vmul.f32 0.03125, %v1311_v4 }
 0xb2e   :  { %v1313_v6 = vadd.f32 1e-06, %v1312_v5  ;;  %v3545_v5 = vld [vmem:[%s5673_s14 + $0x20] sm:$0xff] }
 0xb30   :  { %4428 = vrsqrt.f32 %v1313_v6 }
 0xb3d   :  { %v4429_v7 = vpop.eup %4428 }
 0xb3e   :  { %v1315_v8 = vmul.f32 %v4429_v7, %v5136_v56 }
 0xb40   :  { %4065 = vmatmul.mubr.msk.f32.vlgmr.msra.gmra.mxu0 %vm230_vm3, %v1315_v8 }
 0xb41   :  { %4068 = vmatpush3.msra.mxu0 %v3527_v27  ;;  %4075 = vmatprep.mubr.msk.f32.mxu0 %vm4631_vm0, %v4630_v3 }
 0xb42   :  { %4069 = vmatprep.subr.mxu0 %v4630_v3 }
 0xb43   :  { %4070 = vmatpush3.msra.mxu0 %v3526_v9 }
 0xb44   :  { %4071 = vmatprep.subr.mxu0 %v4630_v3 }
 0xb45   :  { %4072 = vmatpush3.msra.mxu0 %v3525_v12 }
 0xb46   :  { %4073 = vmatprep.subr.mxu0 %v4630_v3 }
 0xb47   :  { %4074 = vmatpush3.msra.mxu0 %v3524_v13 }
 0xb48   :  { %4076 = vmatmul.mubr.msk.f32.vlgmr.msra.gmra.mxu0 %vm230_vm3, %v1315_v8  ;;  %4078 = vmatprep.subr.mxu0 %v4630_v3 }
 0xb49   :  { %4079 = vmatpush3.msra.mxu0 %v3532_v14  ;;  %4086 = vmatprep.mubr.msk.f32.mxu0 %vm4631_vm0, %v4630_v3  ;;  %v3553_v14 = vld [vmem:[%s5674_s15 + $0x38] sm:$0xff] }
 0xb4a   :  { %4080 = vmatprep.subr.mxu0 %v4630_v3 }
 0xb4b   :  { %4081 = vmatpush3.msra.mxu0 %v3531_v15  ;;  %v3552_v15 = vld [vmem:[%s5674_s15 + $0x30] sm:$0xff] }
 0xb4c   :  { %4082 = vmatprep.subr.mxu0 %v4630_v3 }
 0xb4d   :  { %4083 = vmatpush3.msra.mxu0 %v3530_v16  ;;  %v3550_v16 = vld [vmem:[%s5674_s15 + $0x20] sm:$0xff] }
 0xb4e   :  { %4084 = vmatprep.subr.mxu0 %v4630_v3 }
 0xb4f   :  { %4085 = vmatpush3.msra.mxu0 %v3529_v17  ;;  %v3570_v17 = vld [vmem:[%s5675_s16 + $0xf8] sm:$0xff] }
 0xb50   :  { %4087 = vmatmul.mubr.msk.f32.vlgmr.msra.gmra.mxu0 %vm230_vm3, %v1315_v8  ;;  %4089 = vmatprep.subr.mxu0 %v4630_v3 }
 0xb51   :  { %4090 = vmatpush3.msra.mxu0 %v4845_v44  ;;  %4097 = vmatprep.mubr.msk.f32.mxu0 %vm4631_vm0, %v4630_v3 }
 0xb52   :  { %4091 = vmatprep.subr.mxu0 %v4630_v3 }
 0xb53   :  { %4092 = vmatpush3.msra.mxu0 %v4854_v46 }
 0xb54   :  { %4093 = vmatprep.subr.mxu0 %v4630_v3 }
 0xb55   :  { %4094 = vmatpush3.msra.mxu0 %v4879_v49 }
 0xb56   :  { %4095 = vmatprep.subr.mxu0 %v4630_v3 }
 0xb57   :  { %4096 = vmatpush3.msra.mxu0 %v4885_v50 }
 0xb58   :  { %4111 = vmatprep.subr.mxu0 %v4630_v3 }
 0xc00   :  { %v1390_v18 = vpop.f32.mrf.mxu0 }
 0xc01   :  { %v1544_v20 = vmul.f32 %v1390_v18, %v1390_v18 }
 0xc02   :  { %v4066_v44 = vpop.f32.mrf.mxu0 }
 0xc03   :  { %4098 = vmatmul.mubr.msk.f32.vlgmr.msra.gmra.mxu0 %vm230_vm3, %v1544_v20  ;;  %v3568_v20 = vld [vmem:[%s5675_s16 + $0xe8] sm:$0xff]  ;;  %v3567_v44 = vld [vmem:[%s5675_s16 + $0xe0] sm:$0xff] }
 0xc04   :  { %4112 = vmatpush3.msra.mxu0 %v4899_v59  ;;  %4119 = vmatprep.mubr.msk.f32.mxu0 %vm4631_vm0, %v4630_v3 }
 0xc05   :  { %4113 = vmatprep.subr.mxu0 %v4630_v3 }
 0xc06   :  { %4114 = vmatpush3.msra.mxu0 %v4901_v60 }
 0xc07   :  { %4115 = vmatprep.subr.mxu0 %v4630_v3 }
 0xc08   :  { %v1465_v46 = vpop.f32.mrf.mxu0  ;;  %4116 = vmatpush3.msra.mxu0 %v4907_v61 }
 0xc09   :  { %v1620_v22 = vmul.f32 %v1465_v46, %v1465_v46  ;;  %4117 = vmatprep.subr.mxu0 %v4630_v3 }
 0xc0a   :  { %v4077_v25 = vpop.f32.mrf.mxu0  ;;  %4118 = vmatpush3.msra.mxu0 %v4913_v62 }
 0xc0b   :  { %4109 = vmatmul.mubr.msk.f32.vlgmr.msra.gmra.mxu1 %vm230_vm3, %v1620_v22  ;;  %4133 = vmatprep.subr.mxu0 %v4630_v3  ;;  %v3565_v22 = vld [vmem:[%s5675_s16 + $0xd0] sm:$0xff]  ;;  %v3564_v25 = vld [vmem:[%s5675_s16 + $0xc8] sm:$0xff] }
 0xc0c   :  { %4123 = vmatpush3.msra.mxu1 %v4899_v59  ;;  %4130 = vmatprep.mubr.msk.f32.mxu1 %vm4631_vm0, %v4630_v3 }
 0xc0d   :  { %4124 = vmatprep.subr.mxu1 %v4630_v3 }
 0xc0e   :  { %4125 = vmatpush3.msra.mxu1 %v4901_v60 }
 0xc0f   :  { %4126 = vmatprep.subr.mxu1 %v4630_v3 }
 0xc10   :  { %v5225_v29 = vpop.f32.mrf.mxu0  ;;  %4127 = vmatpush3.msra.mxu1 %v4907_v61 }
 0xc11   :  { %4128 = vmatprep.subr.mxu1 %v4630_v3  ;;  %v1854_v63 = vmul.f32 %v5225_v29, %v4945_v21 }
 0xc12   :  { %v4088_v30 = vpop.f32.mrf.mxu0  ;;  %4129 = vmatpush3.msra.mxu1 %v4913_v62 }
 0xc13   :  { %4144 = vmatprep.subr.mxu1 %v4630_v3  ;;  %v3562_v30 = vld [vmem:[%s5675_s16 + $0xb8] sm:$0xff] }
 0xcc3   :  { %v1614_v59 = vpop.f32.mrf.mxu0 }
 0xcc4   :  { %v1615_v31 = vadd.f32 1e-06, %v1614_v59  ;;  %v3561_v59 = vld [vmem:[%s5675_s16 + $0xb0] sm:$0xff] }
 0xcc5   :  { %v4099_v32 = vpop.f32.mrf.mxu0 }
 0xcc6   :  { %4430 = vrsqrt.f32 %v1615_v31  ;;  %v3560_v31 = vld [vmem:[%s5675_s16 + $0xa8] sm:$0xff]  ;;  %v3559_v32 = vld [vmem:[%s5675_s16 + $0xa0] sm:$0xff] }
 0xccb   :  { %v1690_v38 = vpop.f32.mrf.mxu1 }
 0xccc   :  { %v1691_v39 = vadd.f32 1e-06, %v1690_v38  ;;  %v3558_v38 = vld [vmem:[%s5675_s16 + $0x98] sm:$0xff] }
 0xccd   :  { %v4110_v60 = vpop.f32.mrf.mxu1 }
 0xcce   :  { %4432 = vrsqrt.f32 %v1691_v39  ;;  %v3557_v39 = vld [vmem:[%s5675_s16 + $0x90] sm:$0xff] }
 0xcd3   :  { %v4431_v40 = vpop.eup %4430 }
 0xcd4   :  { %v1619_v41 = vmul.f32 %v4431_v40, %v1390_v18  ;;  %v3569_v18 = vld [vmem:[%s5675_s16 + $0xf0] sm:$0xff] }
 0xcd6   :  { %4120 = vmatmul.mubr.msk.f32.vlgmr.msra.gmra.mxu0 %vm230_vm3, %v1619_v41  ;;  %v1696_v52 = vmul.f32 %v1619_v41, %v4962_v26  ;;  %v1855_v26 = vmul.f32 %v5225_v29, %v4941_v19 }
 0xcd7   :  { %4141 = vmatprep.mubr.msk.f32.mxu0 %vm4631_vm0, %v4630_v3 }
 0xcdb   :  { %v4433_v61 = vpop.eup %4432 }
 0xcdc   :  { %v1695_v42 = vmul.f32 %v4433_v61, %v1465_v46  ;;  %v3566_v46 = vld [vmem:[%s5675_s16 + $0xd8] sm:$0xff] }
 0xcde   :  { %4131 = vmatmul.mubr.msk.f32.vlgmr.msra.gmra.mxu1 %vm230_vm3, %v1695_v42  ;;  %v1772_v45 = vmul.f32 %v4932_v10, %v1695_v42 }
 0xcdf   :  { %4145 = vmatpush3.msra.mxu1 %v4976_v33  ;;  %4152 = vmatprep.mubr.msk.f32.mxu1 %vm4631_vm0, %v4630_v3 }
 0xce0   :  { %4146 = vmatprep.subr.mxu1 %v4630_v3 }
 0xce1   :  { %4147 = vmatpush3.msra.mxu1 %v4978_v34 }
 0xce2   :  { %4148 = vmatprep.subr.mxu1 %v4630_v3 }
 0xce3   :  { %4149 = vmatpush3.msra.mxu1 %v4982_v35 }
 0xce4   :  { %4150 = vmatprep.subr.mxu1 %v4630_v3 }
 0xce5   :  { %4151 = vmatpush3.msra.mxu1 %v4986_v36 }
 0xce6   :  { %4155 = vmatprep.subr.mxu1 %v4630_v3 }
 0xd96   :  { %v1766_v62 = vpop.f32.mrf.mxu0 }
 0xd97   :  { %v1770_v10 = vmul.f32 %v4956_v24, %v1766_v62  ;;  %v3556_v62 = vld [vmem:[%s5675_s16 + $0x88] sm:$0xff] }
 0xd98   :  { %v4121_v43 = vpop.f32.mrf.mxu0 }
 0xd99   :  { %v1771_v53 = vadd.f32 %v1770_v10, %v1696_v52  ;;  %v3555_v43 = vld [vmem:[%s5675_s16 + $0x80] sm:$0xff] }
 0xd9e   :  { %v1842_v33 = vpop.f32.mrf.mxu1 }
 0xd9f   :  { %v1846_v47 = vmul.f32 %v4937_v11, %v1842_v33 }
 0xda0   :  { %v4132_v48 = vpop.f32.mrf.mxu1 }
 0xda1   :  { %v1847_v51 = vadd.f32 %v1846_v47, %v1772_v45  ;;  %v5392_v48 = vld [vmem:[#allocation6 + $0x18] sm:$0xff] }
 0xda3   :  { %v1851_v34 = vmul.f32 %v1847_v51, %v4941_v19  ;;  %v1850_v35 = vmul.f32 %v1847_v51, %v4945_v21  ;;  %v1849_v36 = vmul.f32 %v1847_v51, %v4950_v23  ;;  %v1848_v11 = vmul.f32 %v1847_v51, %v4965_v28  ;;  %v3548_v21 = vld [vmem:[%s5673_s14 + $0x38] sm:$0xff]  ;;  %v5398_v51 = vld [vmem:[#allocation6 + $0x10] sm:$0xff] }
 0xda4   :  { %v1852_v19 = vmul.f32 %v5225_v29, %v4965_v28  ;;  %v3546_v28 = vld [vmem:[%s5673_s14 + $0x28] sm:$0xff] }
 0xda5   :  { %4134 = vmatpush3.xpose.msk.msra.mxu0 %vm230_vm3, %v1851_v34 }
 0xda6   :  { %4135 = vmatprep.subr.mxu0 %v4630_v3 }
 0xda9   :  { %4136 = vmatpush3.xpose.msk.msra.mxu0 %vm230_vm3, %v1850_v35  ;;  %v2346_v35 = vstv %s3571_s26 }
 0xdaa   :  { %4137 = vmatprep.subr.mxu0 %v4630_v3 }
 0xdad   :  { %4138 = vmatpush3.xpose.msk.msra.mxu0 %vm230_vm3, %v1849_v36 }
 0xdae   :  { %4139 = vmatprep.subr.mxu0 %v4630_v3 }
 0xdb1   :  { %4140 = vmatpush3.xpose.msk.msra.mxu0 %vm230_vm3, %v1848_v11 }
 0xdb2   :  { %4166 = vmatprep.subr.mxu0 %v4630_v3 }
 0xdb4   :  { %4142 = vmatmul.mubr.msk.f32.vlgmr.msra.gmra.mxu0 %vm230_vm3, %v1771_v53 }
 0xdb5   :  { %4174 = vmatprep.mubr.msk.f32.mxu0 %vm4631_vm0, %v4630_v3  ;;  %4167 = vmatpush3.msra.mxu0 %v3548_v21  ;;  %v3578_v21 = vld [vmem:[%s5671_s12 + $0x48] sm:$0xff] }
 0xdb6   :  { %4168 = vmatprep.subr.mxu0 %v4630_v3 }
 0xe74   :  { %v1937_v54 = vpop.f32.mrf.mxu0 }
 0xe75   :  { %v1938_v55 = vadd.f32 %v1937_v54, %v4995_v37  ;;  %v1853_v37 = vmul.f32 %v5225_v29, %v4950_v23  ;;  %v3547_v23 = vld [vmem:[%s5673_s14 + $0x30] sm:$0xff]  ;;  %v3563_v29 = vld [vmem:[%s5675_s16 + $0xc0] sm:$0xff]  ;;  %v3573_v54 = vld [vmem:[%s5670_s11 + $0x48] sm:$0xff] }
 0xe76   :  { %v4143_v24 = vpop.f32.mrf.mxu0  ;;  %4169 = vmatpush3.msra.mxu0 %v3547_v23  ;;  %v3577_v23 = vld [vmem:[%s5671_s12 + $0x40] sm:$0xff] }
 0xe77   :  { %v1941_v57 = vmul.f32 1.442695, %v1938_v55  ;;  %4170 = vmatprep.subr.mxu0 %v4630_v3  ;;  %v3572_v55 = vld [vmem:[%s5670_s11 + $0x40] sm:$0xff] }
 0xe78   :  { %4171 = vmatpush3.msra.mxu0 %v3546_v28  ;;  %v3585_v28 = vld [vmem:[%s5672_s13 + $0x58] sm:$0xff] }
 0xe79   :  { %4434 = vpow2.f32 %v1941_v57  ;;  %4172 = vmatprep.subr.mxu0 %v4630_v3 }
 0xe7a   :  { %4173 = vmatpush3.msra.mxu0 %v3545_v5  ;;  %v4461_v5 = vld [vmem:[#allocation6] sm:$0xff] }
 0xe7b   :  { %4188 = vmatprep.subr.mxu0 %v4630_v3 }
 0xe86   :  { %v4435_v58 = vpop.eup %4434 }
 0xe87   :  { %4153 = vmatmul.mubr.msk.f32.vlgmr.msra.gmra.mxu1 %vm230_vm3, %v4435_v58 }
 0xe88   :  { %4156 = vmatpush3.msra.mxu1 %v1855_v26  ;;  %4163 = vmatprep.mubr.msk.f32.mxu1 %vm4631_vm0, %v4630_v3 }
 0xe89   :  { %4157 = vmatprep.subr.mxu1 %v4630_v3 }
 0xe8a   :  { %4158 = vmatpush3.msra.mxu1 %v1854_v63 }
 0xe8b   :  { %4159 = vmatprep.subr.mxu1 %v4630_v3 }
 0xe8c   :  { %4160 = vmatpush3.msra.mxu1 %v1853_v37  ;;  %v3580_v37 = vld [vmem:[%s5671_s12 + $0x58] sm:$0xff] }
 0xe8d   :  { %4161 = vmatprep.subr.mxu1 %v4630_v3 }
 0xe8e   :  { %4162 = vmatpush3.msra.mxu1 %v1852_v19  ;;  %v3579_v19 = vld [vmem:[%s5671_s12 + $0x50] sm:$0xff] }
 0xe8f   :  { %4177 = vmatprep.subr.mxu1 %v4630_v3 }
 0xf47   :  { %v2012_v0 = vpop.f32.mrf.mxu1 }
 0xf48   :  { %4436 = vrcp.f32 %v2012_v0  ;;  %v3584_v0 = vld [vmem:[%s5672_s13 + $0x50] sm:$0xff] }
 0xf49   :  { %v4154_v1 = vpop.f32.mrf.mxu1 }
 0xf4a   :  { %v3583_v1 = vld [vmem:[%s5672_s13 + $0x48] sm:$0xff] }
 0xf55   :  { %v4437_v2 = vpop.eup %4436 }
 0xf56   :  { %v2017_v4 = vmul.f32 %v4437_v2, %v4435_v58  ;;  %v3582_v2 = vld [vmem:[%s5672_s13 + $0x40] sm:$0xff] }
 0xf58   :  { %4164 = vmatmul.mubr.msk.f32.vlgmr.msra.gmra.mxu1 %vm230_vm3, %v2017_v4  ;;  %v4460_v4 = vld [vmem:[#allocation6 + $0x8] sm:$0xff] }
 0xf59   :  { %4185 = vmatprep.mubr.msk.f32.mxu1 %vm4631_vm0, %v4630_v3  ;;  %4178 = vmatpush3.msra.mxu1 %v3553_v14 }
 0xf5a   :  { %4179 = vmatprep.subr.mxu1 %v4630_v3 }
 0xf5b   :  { %4180 = vmatpush3.msra.mxu1 %v3552_v15 }
 0xf5c   :  { %4181 = vmatprep.subr.mxu1 %v4630_v3 }
0x1018   :  { %v2087_v6 = vpop.f32.mrf.mxu1 }
0x1019   :  { %4175 = vmatmul.mubr.msk.f32.vlgmr.msra.gmra.mxu0 %vm230_vm3, %v2087_v6 }
0x101a   :  { %v4165_v7 = vpop.f32.mrf.mxu1  ;;  %4220 = vmatprep.mubr.msk.f32.mxu0 %vm4631_vm0, %v4630_v3  ;;  %4189 = vmatpush3.msra.mxu0 %v3570_v17 }
0x101b   :  { %4190 = vmatprep.subr.mxu0 %v4630_v3 }
0x101c   :  { %4191 = vmatpush3.msra.mxu0 %v3569_v18 }
0x101d   :  { %4192 = vmatprep.subr.mxu0 %v4630_v3 }
0x101e   :  { %4193 = vmatpush3.msra.mxu0 %v3568_v20 }
0x101f   :  { %4194 = vmatprep.subr.mxu0 %v4630_v3 }
0x1020   :  { %4195 = vmatpush3.msra.mxu0 %v3567_v44 }
0x1021   :  { %4196 = vmatprep.subr.mxu0 %v4630_v3 }
0x1022   :  { %4197 = vmatpush3.msra.mxu0 %v3566_v46 }
0x1023   :  { %4198 = vmatprep.subr.mxu0 %v4630_v3 }
0x1024   :  { %4199 = vmatpush3.msra.mxu0 %v3565_v22 }
0x1025   :  { %4200 = vmatprep.subr.mxu0 %v4630_v3 }
0x1026   :  { %4201 = vmatpush3.msra.mxu0 %v3564_v25 }
0x1027   :  { %4202 = vmatprep.subr.mxu0 %v4630_v3 }
0x1028   :  { %4203 = vmatpush3.msra.mxu0 %v3563_v29 }
0x1029   :  { %4204 = vmatprep.subr.mxu0 %v4630_v3 }
0x102a   :  { %4205 = vmatpush3.msra.mxu0 %v3562_v30 }
0x102b   :  { %4206 = vmatprep.subr.mxu0 %v4630_v3 }
0x102c   :  { %4207 = vmatpush3.msra.mxu0 %v3561_v59 }
0x102d   :  { %4208 = vmatprep.subr.mxu0 %v4630_v3 }
0x102e   :  { %4209 = vmatpush3.msra.mxu0 %v3560_v31 }
0x102f   :  { %4210 = vmatprep.subr.mxu0 %v4630_v3 }
0x1030   :  { %4211 = vmatpush3.msra.mxu0 %v3559_v32  ;;  %v4466_v32 = vld [vmem:[#allocation10 + $0x18] sm:$0xff] }
0x1031   :  { %4212 = vmatprep.subr.mxu0 %v4630_v3 }
0x1032   :  { %4213 = vmatpush3.msra.mxu0 %v3558_v38  ;;  %v4467_v38 = vld [vmem:[#allocation10 + $0x10] sm:$0xff] }
0x1033   :  { %4214 = vmatprep.subr.mxu0 %v4630_v3 }
0x1034   :  { %4215 = vmatpush3.msra.mxu0 %v3557_v39  ;;  %v4468_v39 = vld [vmem:[#allocation10 + $0x8] sm:$0xff] }
0x1035   :  { %4216 = vmatprep.subr.mxu0 %v4630_v3 }
0x1036   :  { %4217 = vmatpush3.msra.mxu0 %v3556_v62 }
0x1037   :  { %4218 = vmatprep.subr.mxu0 %v4630_v3 }
0x1038   :  { %4219 = vmatpush3.msra.mxu0 %v3555_v43  ;;  %v4471_v43 = vld [vmem:[%s5663_s4 + $0x18] sm:$0xff] }
0x1039   :  { %4267 = vmatprep.subr.mxu0 %v4630_v3 }
0x10d9   :  { %v2165_v8 = vpop.f32.mrf.mxu0 }
0x10da   :  { %v5303_v27 = vadd.f32 %v2165_v8, %v5136_v56  ;;  %v3551_v56 = vld [vmem:[%s5674_s15 + $0x28] sm:$0xff] }
0x10db   :  { %v4176_v9 = vpop.f32.mrf.mxu0  ;;  %4182 = vmatpush3.msra.mxu1 %v3551_v56  ;;  %v4465_v56 = vld [vmem:[#allocation7] sm:$0xff] }
0x10dc   :  { %v2170_v12 = vmul.f32 %v5303_v27, %v5303_v27  ;;  %4183 = vmatprep.subr.mxu1 %v4630_v3  ;;  %v4463_v9 = vld [vmem:[#allocation7 + $0x10] sm:$0xff] }
0x10dd   :  { %4184 = vmatpush3.msra.mxu1 %v3550_v16 }
0x10de   :  { %v2171_v13 = vsel %vm230_vm3, %v2170_v12, 0.0  ;;  %4223 = vmatprep.subr.mxu1 %v4630_v3 }
0x10df   :  { %2172 = vadd.xlane.f32.xlu1 %v2171_v13  ;;  %v4464_v13 = vld [vmem:[#allocation7 + $0x8] sm:$0xff] }
0x1168   :  { %v2173_v60 = vpop.xlane.xlu1 %2172 }
0x1169   :  { %v2174_v40 = vmul.f32 0.03125, %v2173_v60  ;;  %v4469_v60 = vld [vmem:[#allocation10] sm:$0xff] }
0x116b   :  { %v2175_v41 = vadd.f32 1e-06, %v2174_v40 }
0x116d   :  { %4438 = vrsqrt.f32 %v2175_v41 }
0x117a   :  { %v4439_v61 = vpop.eup %4438 }
0x117b   :  { %v2177_v42 = vmul.f32 %v4439_v61, %v5303_v27 }
0x117d   :  { %4186 = vmatmul.mubr.msk.f32.vlgmr.msra.gmra.mxu1 %vm230_vm3, %v2177_v42  ;;  %v4470_v42 = vld [vmem:[%s5663_s4 + $0x10] sm:$0xff] }
0x117e   :  { %4231 = vmatprep.mubr.msk.f32.mxu1 %vm4631_vm0, %v4630_v3 }
0x123d   :  { %v2252_v33 = vpop.f32.mrf.mxu1 }
0x123e   :  { %v2256_v45 = vmax.f32 %v2252_v33, 0.0 }
0x123f   :  { %v4187_v47 = vpop.f32.mrf.mxu1 }
0x1240   :  { %4221 = vmatmul.mubr.f32.vlgmr.msra.gmra.mxu0 %v2256_v45 }
0x1241   :  { %4268 = vmatpush3.msra.mxu0 %v5392_v48  ;;  %4275 = vmatprep.mubr.msk.f32.mxu0 %vm4631_vm0, %v4630_v3 }
0x1242   :  { %4269 = vmatprep.subr.mxu0 %v4630_v3 }
0x1243   :  { %4270 = vmatpush3.msra.mxu0 %v5398_v51 }
0x1244   :  { %4271 = vmatprep.subr.mxu0 %v4630_v3 }
0x1245   :  { %4272 = vmatpush3.msra.mxu0 %v4879_v49  ;;  %v3575_v49 = vld [vmem:[%s5670_s11 + $0x58] sm:$0xff] }
0x1246   :  { %4273 = vmatprep.subr.mxu0 %v4630_v3  ;;  %4224 = vmatpush3.msra.mxu1 %v3575_v49  ;;  %v4476_v49 = vld [vmem:[#allocation9] sm:$0xff] }
0x1247   :  { %4274 = vmatpush3.msra.mxu0 %v4885_v50  ;;  %v3574_v50 = vld [vmem:[%s5670_s11 + $0x50] sm:$0xff]  ;;  %4225 = vmatprep.subr.mxu1 %v4630_v3 }
0x1248   :  { %4289 = vmatprep.subr.mxu0 %v4630_v3  ;;  %4226 = vmatpush3.msra.mxu1 %v3574_v50 }
0x1249   :  { %4227 = vmatprep.subr.mxu1 %v4630_v3 }
0x124a   :  { %4228 = vmatpush3.msra.mxu1 %v3573_v54  ;;  %v4477_v54 = vld [vmem:[%s5663_s4] sm:$0xff] }
0x124b   :  { %4229 = vmatprep.subr.mxu1 %v4630_v3 }
0x124c   :  { %4230 = vmatpush3.msra.mxu1 %v3572_v55 }
0x124d   :  { %4234 = vmatprep.subr.mxu1 %v4630_v3 }
0x1300   :  { %v2340_v34 = vpop.f32.mrf.mxu0 }
0x1301   :  { %v2344_v36 = vadd.f32 %v2340_v34, %v5303_v27  ;;  %v4462_v27 = vld [vmem:[#allocation7 + $0x18] sm:$0xff]  ;;  %v4473_v34 = vld [vmem:[#allocation9 + $0x10] sm:$0xff] }
0x1302   :  { %v4222_v10 = vpop.f32.mrf.mxu0 }
0x1303   :  { %v5407_v11 = vmul.f32 %v2346_v35, %v2344_v36  ;;  %v4474_v36 = vld [vmem:[#allocation9 + $0x8] sm:$0xff] }
0x1305   :  { %v2348_v52 = vmul.f32 %v5407_v11, %v5407_v11 }
0x1307   :  { %v2349_v53 = vsel %vm230_vm3, %v2348_v52, 0.0  ;;  %v4475_v52 = vld [vmem:[%s5663_s4 + $0x8] sm:$0xff] }
0x1308   :  { %2350 = vadd.xlane.f32.xlu1 %v2349_v53 }
0x1391   :  { %v2351_v24 = vpop.xlane.xlu1 %2350 }
0x1392   :  { %v2352_v57 = vmul.f32 0.03125, %v2351_v24 }
0x1394   :  { %v2353_v58 = vadd.f32 1e-06, %v2352_v57 }
0x1396   :  { %4440 = vrsqrt.f32 %v2353_v58  ;;  %v4478_v58 = vld [vmem:[%s5668_s9] sm:$0xff] }
0x13a3   :  { %v4441_v26 = vpop.eup %4440 }
0x13a4   :  { %v2355_v63 = vmul.f32 %v4441_v26, %v5407_v11 }
0x13a6   :  { %4232 = vmatmul.mubr.msk.f32.vlgmr.msra.gmra.mxu1 %vm230_vm3, %v2355_v63 }
0x13a7   :  { %4235 = vmatpush3.msra.mxu1 %v3580_v37  ;;  %4242 = vmatprep.mubr.msk.f32.mxu1 %vm4631_vm0, %v4630_v3 }
0x13a8   :  { %4236 = vmatprep.subr.mxu1 %v4630_v3 }
0x13a9   :  { %4237 = vmatpush3.msra.mxu1 %v3579_v19 }
0x13aa   :  { %4238 = vmatprep.subr.mxu1 %v4630_v3 }
0x13ab   :  { %4239 = vmatpush3.msra.mxu1 %v3578_v21 }
0x13ac   :  { %4240 = vmatprep.subr.mxu1 %v4630_v3 }
0x13ad   :  { %4241 = vmatpush3.msra.mxu1 %v3577_v23 }
0x13ae   :  { %4243 = vmatmul.mubr.msk.f32.vlgmr.msra.gmra.mxu1 %vm230_vm3, %v2355_v63  ;;  %4245 = vmatprep.subr.mxu1 %v4630_v3 }
0x13af   :  { %4246 = vmatpush3.msra.mxu1 %v3585_v28  ;;  %4253 = vmatprep.mubr.msk.f32.mxu1 %vm4631_vm0, %v4630_v3 }
0x13b0   :  { %4247 = vmatprep.subr.mxu1 %v4630_v3 }
0x13b1   :  { %4248 = vmatpush3.msra.mxu1 %v3584_v0 }
0x13b2   :  { %4249 = vmatprep.subr.mxu1 %v4630_v3 }
0x13b3   :  { %4250 = vmatpush3.msra.mxu1 %v3583_v1  ;;  %v3601_v1 = vld [vmem:[%s5673_s14 + $0x58] sm:$0xff] }
0x13b4   :  { %4251 = vmatprep.subr.mxu1 %v4630_v3 }
0x13b5   :  { %4252 = vmatpush3.msra.mxu1 %v3582_v2  ;;  %v3600_v2 = vld [vmem:[%s5673_s14 + $0x50] sm:$0xff] }
0x13b6   :  { %4254 = vmatmul.mubr.msk.f32.vlgmr.msra.gmra.mxu1 %vm230_vm3, %v2355_v63  ;;  %4256 = vmatprep.subr.mxu1 %v4630_v3 }
0x13b7   :  { %4257 = vmatpush3.msra.mxu1 %v5392_v48  ;;  %4264 = vmatprep.mubr.msk.f32.mxu1 %vm4631_vm0, %v4630_v3  ;;  %v4472_v48 = vld [vmem:[#allocation9 + $0x18] sm:$0xff] }
0x13b8   :  { %4258 = vmatprep.subr.mxu1 %v4630_v3 }
0x13b9   :  { %4259 = vmatpush3.msra.mxu1 %v5398_v51 }
0x13ba   :  { %4260 = vmatprep.subr.mxu1 %v4630_v3 }
0x13bb   :  { %4261 = vmatpush3.msra.mxu1 %v4460_v4  ;;  %v3599_v4 = vld [vmem:[%s5673_s14 + $0x48] sm:$0xff] }
0x13bc   :  { %4262 = vmatprep.subr.mxu1 %v4630_v3 }
0x13bd   :  { %4263 = vmatpush3.msra.mxu1 %v4461_v5 }
0x13be   :  { %4278 = vmatprep.subr.mxu1 %v4630_v3 }
0x1466   :  { %v2430_v6 = vpop.f32.mrf.mxu1 }
0x1467   :  { %v2584_v7 = vmul.f32 %v2430_v6, %v2430_v6 }
0x1468   :  { %v4233_v8 = vpop.f32.mrf.mxu1 }
0x1469   :  { %4265 = vmatmul.mubr.msk.f32.vlgmr.msra.gmra.mxu1 %vm230_vm3, %v2584_v7 }
0x146a   :  { %4279 = vmatpush3.msra.mxu1 %v4462_v27  ;;  %4286 = vmatprep.mubr.msk.f32.mxu1 %vm4631_vm0, %v4630_v3 }
0x146b   :  { %4280 = vmatprep.subr.mxu1 %v4630_v3 }
0x146c   :  { %4281 = vmatpush3.msra.mxu1 %v4463_v9 }
0x146d   :  { %4282 = vmatprep.subr.mxu1 %v4630_v3 }
0x146e   :  { %v2505_v12 = vpop.f32.mrf.mxu1  ;;  %4283 = vmatpush3.msra.mxu1 %v4464_v13 }
0x146f   :  { %v2660_v14 = vmul.f32 %v2505_v12, %v2505_v12  ;;  %4284 = vmatprep.subr.mxu1 %v4630_v3 }
0x1470   :  { %v4244_v15 = vpop.f32.mrf.mxu1  ;;  %4285 = vmatpush3.msra.mxu1 %v4465_v56 }
0x1471   :  { %4276 = vmatmul.mubr.msk.f32.vlgmr.msra.gmra.mxu0 %vm230_vm3, %v2660_v14  ;;  %4300 = vmatprep.subr.mxu1 %v4630_v3 }
0x1472   :  { %4290 = vmatpush3.msra.mxu0 %v4462_v27  ;;  %4297 = vmatprep.mubr.msk.f32.mxu0 %vm4631_vm0, %v4630_v3  ;;  %v3598_v27 = vld [vmem:[%s5673_s14 + $0x40] sm:$0xff] }
0x1473   :  { %4291 = vmatprep.subr.mxu0 %v4630_v3 }
0x1474   :  { %4292 = vmatpush3.msra.mxu0 %v4463_v9 }
0x1475   :  { %4293 = vmatprep.subr.mxu0 %v4630_v3 }
0x1476   :  { %v5488_v16 = vpop.f32.mrf.mxu1  ;;  %4294 = vmatpush3.msra.mxu0 %v4464_v13 }
0x1477   :  { %4295 = vmatprep.subr.mxu0 %v4630_v3  ;;  %v2895_v21 = vmul.f32 %v4472_v48, %v5488_v16  ;;  %v2894_v23 = vmul.f32 %v4473_v34, %v5488_v16  ;;  %v2893_v28 = vmul.f32 %v4474_v36, %v5488_v16  ;;  %v2892_v0 = vmul.f32 %v4476_v49, %v5488_v16 }
0x1478   :  { %v4255_v17 = vpop.f32.mrf.mxu1  ;;  %4296 = vmatpush3.msra.mxu0 %v4465_v56 }
0x1479   :  { %4311 = vmatprep.subr.mxu0 %v4630_v3  ;;  %v3606_v17 = vld [vmem:[%s5674_s15 + $0x58] sm:$0xff] }
0x1529   :  { %v2654_v18 = vpop.f32.mrf.mxu1 }
0x152a   :  { %v2655_v20 = vadd.f32 1e-06, %v2654_v18  ;;  %v3605_v18 = vld [vmem:[%s5674_s15 + $0x50] sm:$0xff] }
0x152b   :  { %v4266_v44 = vpop.f32.mrf.mxu1 }
0x152c   :  { %4442 = vrsqrt.f32 %v2655_v20  ;;  %v3603_v20 = vld [vmem:[%s5674_s15 + $0x40] sm:$0xff]  ;;  %v3623_v44 = vld [vmem:[%s5675_s16 + $0x178] sm:$0xff] }
0x1531   :  { %v2730_v46 = vpop.f32.mrf.mxu0 }
0x1532   :  { %v2731_v22 = vadd.f32 1e-06, %v2730_v46  ;;  %v3622_v46 = vld [vmem:[%s5675_s16 + $0x170] sm:$0xff] }
0x1533   :  { %v4277_v25 = vpop.f32.mrf.mxu0 }
0x1534   :  { %4444 = vrsqrt.f32 %v2731_v22  ;;  %v3621_v22 = vld [vmem:[%s5675_s16 + $0x168] sm:$0xff]  ;;  %v3620_v25 = vld [vmem:[%s5675_s16 + $0x160] sm:$0xff] }
0x1539   :  { %v4443_v29 = vpop.eup %4442 }
0x153a   :  { %v2659_v30 = vmul.f32 %v4443_v29, %v2430_v6  ;;  %v3619_v29 = vld [vmem:[%s5675_s16 + $0x158] sm:$0xff] }
0x153c   :  { %4287 = vmatmul.mubr.msk.f32.vlgmr.msra.gmra.mxu1 %vm230_vm3, %v2659_v30  ;;  %v2736_v55 = vmul.f32 %v4477_v54, %v2659_v30  ;;  %v3618_v30 = vld [vmem:[%s5675_s16 + $0x150] sm:$0xff]  ;;  %v3394_v54 = vld [vmem:[#allocation12 + $0x8] sm:$0xff] }
0x153d   :  { %4308 = vmatprep.mubr.msk.f32.mxu1 %vm4631_vm0, %v4630_v3 }
0x1541   :  { %v4445_v59 = vpop.eup %4444 }
0x1542   :  { %v2735_v31 = vmul.f32 %v4445_v59, %v2505_v12  ;;  %v3617_v59 = vld [vmem:[%s5675_s16 + $0x148] sm:$0xff] }
0x1544   :  { %4298 = vmatmul.mubr.msk.f32.vlgmr.msra.gmra.mxu0 %vm230_vm3, %v2735_v31  ;;  %v2812_v62 = vmul.f32 %v4470_v42, %v2735_v31  ;;  %v3616_v31 = vld [vmem:[%s5675_s16 + $0x140] sm:$0xff] }
0x1545   :  { %4312 = vmatpush3.msra.mxu0 %v4466_v32  ;;  %4319 = vmatprep.mubr.msk.f32.mxu0 %vm4631_vm0, %v4630_v3  ;;  %v3615_v32 = vld [vmem:[%s5675_s16 + $0x138] sm:$0xff] }
0x1546   :  { %4313 = vmatprep.subr.mxu0 %v4630_v3 }
0x1547   :  { %4314 = vmatpush3.msra.mxu0 %v4467_v38  ;;  %v3614_v38 = vld [vmem:[%s5675_s16 + $0x130] sm:$0xff] }
0x1548   :  { %4315 = vmatprep.subr.mxu0 %v4630_v3 }
0x1549   :  { %4316 = vmatpush3.msra.mxu0 %v4468_v39  ;;  %v3613_v39 = vld [vmem:[%s5675_s16 + $0x128] sm:$0xff] }
0x154a   :  { %4317 = vmatprep.subr.mxu0 %v4630_v3 }
0x154b   :  { %4318 = vmatpush3.msra.mxu0 %v4469_v60  ;;  %v3612_v60 = vld [vmem:[%s5675_s16 + $0x120] sm:$0xff] }
0x154c   :  { %4322 = vmatprep.subr.mxu0 %v4630_v3 }
0x15fc   :  { %v2806_v40 = vpop.f32.mrf.mxu1 }
0x15fd   :  { %v2810_v53 = vmul.f32 %v4475_v52, %v2806_v40  ;;  %v3611_v40 = vld [vmem:[%s5675_s16 + $0x118] sm:$0xff] }
0x15fe   :  { %v4288_v41 = vpop.f32.mrf.mxu1 }
0x15ff   :  { %v2811_v24 = vadd.f32 %v2810_v53, %v2736_v55  ;;  %v3610_v41 = vld [vmem:[%s5675_s16 + $0x110] sm:$0xff]  ;;  %v3393_v55 = vld [vmem:[#allocation12] sm:$0xff] }
0x1604   :  { %v2882_v61 = vpop.f32.mrf.mxu0 }
0x1605   :  { %v2886_v33 = vmul.f32 %v4471_v43, %v2882_v61 }
0x1606   :  { %v4299_v45 = vpop.f32.mrf.mxu0 }
0x1607   :  { %v2887_v47 = vadd.f32 %v2886_v33, %v2812_v62  ;;  %v3609_v45 = vld [vmem:[%s5675_s16 + $0x108] sm:$0xff] }
0x1609   :  { %v2891_v51 = vmul.f32 %v4472_v48, %v2887_v47  ;;  %v2890_v35 = vmul.f32 %v4473_v34, %v2887_v47  ;;  %v2889_v10 = vmul.f32 %v4474_v36, %v2887_v47  ;;  %v2888_v50 = vmul.f32 %v4476_v49, %v2887_v47  ;;  %v3608_v47 = vld [vmem:[%s5675_s16 + $0x100] sm:$0xff]  ;;  %v3396_v49 = vld [vmem:[#allocation12 + $0x18] sm:$0xff]  ;;  %s4632_s16 = smov [#allocation13]  }
0x160a   :  { %s3484_s28 = sshll.u32 %s4632_s16, 4  ;;  %s3485_s28 = int_to_ptr.vmem [resolvable:$true] %s3484_s28 }
0x160b   :  { %4301 = vmatpush3.xpose.msk.msra.mxu1 %vm230_vm3, %v2891_v51  ;;  %s4591_s30 = scalar_lea.vmem %s3485_s28, 128  ;;  %p4596_p3 = scmp.lt.s32.totalorder %s3485_s28, %s3485_s28 }
0x160c   :  { %4302 = vmatprep.subr.mxu1 %v4630_v3  ;;  %p4592_p2 = scmp.ne.s32.totalorder %s3485_s28, %s4591_s30  ;;  %p4597_p4 = scmp.lt.s32.totalorder %s4591_s30, %s4591_s30 }
0x160e   :  { %p4598_p5 = por %p4597_p4, %p4596_p3 }
0x160f   :  { %4303 = vmatpush3.xpose.msk.msra.mxu1 %vm230_vm3, %v2890_v35 }
0x1610   :  { %4304 = vmatprep.subr.mxu1 %v4630_v3  ;;  %p4599_p6 = pnand %p4598_p5, %p4592_p2 }
0x1613   :  { %4305 = vmatpush3.xpose.msk.msra.mxu1 %vm230_vm3, %v2889_v10 }
0x1614   :  { %4306 = vmatprep.subr.mxu1 %v4630_v3 }
0x1617   :  { %4307 = vmatpush3.xpose.msk.msra.mxu1 %vm230_vm3, %v2888_v50  ;;  %v3395_v50 = vld [vmem:[#allocation12 + $0x10] sm:$0xff] }
0x1618   :  { %4333 = vmatprep.subr.mxu1 %v4630_v3 }
0x161a   :  { %4309 = vmatmul.mubr.msk.f32.vlgmr.msra.gmra.mxu1 %vm230_vm3, %v2811_v24 }
0x161b   :  { %4341 = vmatprep.mubr.msk.f32.mxu1 %vm4631_vm0, %v4630_v3  ;;  %4334 = vmatpush3.msra.mxu1 %v3601_v1 }
0x161c   :  { %4335 = vmatprep.subr.mxu1 %v4630_v3 }
0x161d   :  { %4336 = vmatpush3.msra.mxu1 %v3600_v2 }
0x161e   :  { %4337 = vmatprep.subr.mxu1 %v4630_v3 }
0x161f   :  { %4338 = vmatpush3.msra.mxu1 %v3599_v4 }
0x1620   :  { %4339 = vmatprep.subr.mxu1 %v4630_v3 }
0x1621   :  { %4340 = vmatpush3.msra.mxu1 %v3598_v27 }
0x1622   :  { %4355 = vmatprep.subr.mxu1 %v4630_v3 }
0x16da   :  { %v2977_v57 = vpop.f32.mrf.mxu1 }
0x16db   :  { %v2978_v26 = vadd.f32 %v4478_v58, %v2977_v57 }
0x16dc   :  { %v4310_v63 = vpop.f32.mrf.mxu1 }
0x16dd   :  { %v2981_v37 = vmul.f32 1.442695, %v2978_v26 }
0x16df   :  { %4446 = vpow2.f32 %v2981_v37 }
0x16ec   :  { %v4447_v19 = vpop.eup %4446 }
0x16ed   :  { %4320 = vmatmul.mubr.msk.f32.vlgmr.msra.gmra.mxu0 %vm230_vm3, %v4447_v19 }
0x16ee   :  { %4323 = vmatpush3.msra.mxu0 %v2895_v21  ;;  %4330 = vmatprep.mubr.msk.f32.mxu0 %vm4631_vm0, %v4630_v3 }
0x16ef   :  { %4324 = vmatprep.subr.mxu0 %v4630_v3 }
0x16f0   :  { %4325 = vmatpush3.msra.mxu0 %v2894_v23 }
0x16f1   :  { %4326 = vmatprep.subr.mxu0 %v4630_v3 }
0x16f2   :  { %4327 = vmatpush3.msra.mxu0 %v2893_v28 }
0x16f3   :  { %4328 = vmatprep.subr.mxu0 %v4630_v3 }
0x16f4   :  { %4329 = vmatpush3.msra.mxu0 %v2892_v0 }
0x16f5   :  { %4344 = vmatprep.subr.mxu0 %v4630_v3 }
0x17ad   :  { %v3052_v5 = vpop.f32.mrf.mxu0 }
0x17ae   :  { %4448 = vrcp.f32 %v3052_v5 }
0x17af   :  { %v4321_v6 = vpop.f32.mrf.mxu0 }
0x17bb   :  { %v4449_v7 = vpop.eup %4448 }
0x17bc   :  { %v3057_v8 = vmul.f32 %v4449_v7, %v4447_v19 }
0x17be   :  { %4331 = vmatmul.mubr.msk.f32.vlgmr.msra.gmra.mxu0 %vm230_vm3, %v3057_v8 }
0x17bf   :  { %4352 = vmatprep.mubr.msk.f32.mxu0 %vm4631_vm0, %v4630_v3  ;;  %4345 = vmatpush3.msra.mxu0 %v3606_v17 }
0x17c0   :  { %4346 = vmatprep.subr.mxu0 %v4630_v3 }
0x17c1   :  { %4347 = vmatpush3.msra.mxu0 %v3605_v18 }
0x17c2   :  { %4348 = vmatprep.subr.mxu0 %v4630_v3 }
0x187e   :  { %v3127_v9 = vpop.f32.mrf.mxu0 }
0x187f   :  { %4342 = vmatmul.mubr.msk.f32.vlgmr.msra.gmra.mxu1 %vm230_vm3, %v3127_v9 }
0x1880   :  { %v4332_v12 = vpop.f32.mrf.mxu0  ;;  %4387 = vmatprep.mubr.msk.f32.mxu1 %vm4631_vm0, %v4630_v3  ;;  %4356 = vmatpush3.msra.mxu1 %v3623_v44 }
0x1881   :  { %4357 = vmatprep.subr.mxu1 %v4630_v3 }
0x1882   :  { %4358 = vmatpush3.msra.mxu1 %v3622_v46 }
0x1883   :  { %4359 = vmatprep.subr.mxu1 %v4630_v3 }
0x1884   :  { %4360 = vmatpush3.msra.mxu1 %v3621_v22 }
0x1885   :  { %4361 = vmatprep.subr.mxu1 %v4630_v3 }
0x1886   :  { %4362 = vmatpush3.msra.mxu1 %v3620_v25 }
0x1887   :  { %4363 = vmatprep.subr.mxu1 %v4630_v3 }
0x1888   :  { %4364 = vmatpush3.msra.mxu1 %v3619_v29 }
0x1889   :  { %4365 = vmatprep.subr.mxu1 %v4630_v3 }
0x188a   :  { %4366 = vmatpush3.msra.mxu1 %v3618_v30 }
0x188b   :  { %4367 = vmatprep.subr.mxu1 %v4630_v3 }
0x188c   :  { %4368 = vmatpush3.msra.mxu1 %v3617_v59 }
0x188d   :  { %4369 = vmatprep.subr.mxu1 %v4630_v3 }
0x188e   :  { %4370 = vmatpush3.msra.mxu1 %v3616_v31 }
0x188f   :  { %4371 = vmatprep.subr.mxu1 %v4630_v3 }
0x1890   :  { %4372 = vmatpush3.msra.mxu1 %v3615_v32 }
0x1891   :  { %4373 = vmatprep.subr.mxu1 %v4630_v3 }
0x1892   :  { %4374 = vmatpush3.msra.mxu1 %v3614_v38 }
0x1893   :  { %4375 = vmatprep.subr.mxu1 %v4630_v3 }
0x1894   :  { %4376 = vmatpush3.msra.mxu1 %v3613_v39 }
0x1895   :  { %4377 = vmatprep.subr.mxu1 %v4630_v3 }
0x1896   :  { %4378 = vmatpush3.msra.mxu1 %v3612_v60 }
0x1897   :  { %4379 = vmatprep.subr.mxu1 %v4630_v3 }
0x1898   :  { %4380 = vmatpush3.msra.mxu1 %v3611_v40 }
0x1899   :  { %4381 = vmatprep.subr.mxu1 %v4630_v3 }
0x189a   :  { %4382 = vmatpush3.msra.mxu1 %v3610_v41 }
0x189b   :  { %4383 = vmatprep.subr.mxu1 %v4630_v3 }
0x189c   :  { %4384 = vmatpush3.msra.mxu1 %v3609_v45 }
0x189d   :  { %4385 = vmatprep.subr.mxu1 %v4630_v3 }
0x189e   :  { %4386 = vmatpush3.msra.mxu1 %v3608_v47 }
0x193f   :  { %v3205_v13 = vpop.f32.mrf.mxu1 }
0x1940   :  { %v5562_v14 = vadd.f32 %v3205_v13, %v5407_v11  ;;  %v3604_v11 = vld [vmem:[%s5674_s15 + $0x48] sm:$0xff] }
0x1941   :  { %v4343_v15 = vpop.f32.mrf.mxu1  ;;  %4349 = vmatpush3.msra.mxu0 %v3604_v11 }
0x1942   :  { %v3210_v56 = vmul.f32 %v5562_v14, %v5562_v14  ;;  %4350 = vmatprep.subr.mxu0 %v4630_v3 }
0x1943   :  { %4351 = vmatpush3.msra.mxu0 %v3603_v20 }
0x1944   :  { %v3211_v16 = vsel %vm230_vm3, %v3210_v56, 0.0  ;;  %4390 = vmatprep.subr.mxu0 %v4630_v3 }
0x1945   :  { %3212 = vadd.xlane.f32.xlu1 %v3211_v16 }
0x19ce   :  { %v3213_v61 = vpop.xlane.xlu1 %3212 }
0x19cf   :  { %v3214_v42 = vmul.f32 0.03125, %v3213_v61 }
0x19d1   :  { %v3215_v62 = vadd.f32 1e-06, %v3214_v42 }
0x19d3   :  { %4450 = vrsqrt.f32 %v3215_v62 }
0x19e0   :  { %v4451_v43 = vpop.eup %4450 }
0x19e1   :  { %v3217_v33 = vmul.f32 %v4451_v43, %v5562_v14 }
0x19e3   :  { %4353 = vmatmul.mubr.msk.f32.vlgmr.msra.gmra.mxu0 %vm230_vm3, %v3217_v33 }
0x19e4   :  { %4398 = vmatprep.mubr.msk.f32.mxu0 %vm4631_vm0, %v4630_v3  ;;  %4391 = vmatpush3.msra.mxu0 %v3396_v49 }
0x19e5   :  { %4392 = vmatprep.subr.mxu0 %v4630_v3 }
0x19e6   :  { %4393 = vmatpush3.msra.mxu0 %v3395_v50 }
0x19e7   :  { %4394 = vmatprep.subr.mxu0 %v4630_v3 }
0x19e8   :  { %4395 = vmatpush3.msra.mxu0 %v3394_v54 }
0x19e9   :  { %4396 = vmatprep.subr.mxu0 %v4630_v3 }
0x19ea   :  { %4397 = vmatpush3.msra.mxu0 %v3393_v55 }
0x1aa3   :  { %v3292_v48 = vpop.f32.mrf.mxu0 }
0x1aa4   :  { %v3296_v51 = vmax.f32 %v3292_v48, 0.0 }
0x1aa5   :  { %v4354_v34 = vpop.f32.mrf.mxu0 }
0x1aa6   :  { %4388 = vmatmul.mubr.f32.vlgmr.msra.gmra.mxu1 %v3296_v51 }
0x1b66   :  { %v3380_v35 = vpop.f32.mrf.mxu1 }
0x1b67   :  { %v3384_v36 = vadd.f32 %v3380_v35, %v5562_v14 }
0x1b68   :  { %v4389_v10 = vpop.f32.mrf.mxu1 }
0x1b69   :  { %v3385_v52 = vmul.f32 %v3384_v36, %v3384_v36 }
0x1b6b   :  { %v3386_v53 = vsel %vm230_vm3, %v3385_v52, 0.0 }
0x1b6c   :  { %3387 = vadd.xlane.f32.xlu1 %v3386_v53 }
0x1bf5   :  { %v3388_v24 = vpop.xlane.xlu1 %3387 }
0x1bf6   :  { %v3389_v57 = vmul.f32 0.03125, %v3388_v24 }
0x1bf8   :  { %v3390_v58 = vadd.f32 1e-06, %v3389_v57 }
0x1bfa   :  { %4452 = vrsqrt.f32 %v3390_v58 }
0x1c07   :  { %v4453_v26 = vpop.eup %4452 }
0x1c08   :  { %v3392_v63 = vmul.f32 %v4453_v26, %v3384_v36 }
0x1c0a   :  { %4399 = vmatmul.mubr.msk.f32.vlgmr.msra.gmra.mxu0 %vm230_vm3, %v3392_v63 }
0x1cca   :  { %v3466_v37 = vpop.f32.mrf.mxu0 }
0x1ccb   :  { %v3470_v19 = vmul.f32 0.023570227, %v3466_v37 }
0x1ccc   :  { %v4400_v21 = vpop.f32.mrf.mxu0 }
0x1ccd   :  { %v3471_v23 = vsub.f32 0.0, %v3470_v19 }
0x1ccf   :  { %v3472_v28 = vmul.f32 1.442695, %v3471_v23 }
0x1cd1   :  { %4454 = vpow2.f32 %v3472_v28 }
0x1cde   :  { %v4455_v0 = vpop.eup %4454 }
0x1cdf   :  { %v3474_v1 = vadd.f32 1.0, %v4455_v0 }
0x1ce1   :  { %4456 = vrcp.f32 %v3474_v1 }
0x1cee   :  { %v4457_v3 = vpop.eup %4456 }
0x1cef   :  { %v3476_v2 = vmul.f32 30.0, %v4457_v3 }
0x1cf1   :  { %3477 = vst [vmem:[#allocation13] sm:$0xff] %v3476_v2 }
0x1cf2   :  { %4602 = shalt.err (!%p4599_p6)
}
0x1cf3   :  { %3487 = dma.vmem_to_hbm [thread:$0]  %s3485_s28, 128, %s5676_s17, [#allocation4]  }
0x1cf4   :  { %4619 = dma.done.wait [#allocation4], 128  }
0x1cf5   :  { %4620 = vsyncadd [#allocation4], 4294967168 }
0x1cf6   :  { %3491 = vsyncpa [#allocation3], 1 }
0x1cf7   :  { %3492 = vsyncpa [#allocation8], 1 }
0x1cf8   :  { %3493 = vsyncpa [#allocation11], 1 }
0x1cf9   :  { %3494 = vsyncpa [#allocation4], 1 }
0x1cfa   :  { %3495 = vsyncpa [#allocation5], 1 }

</bundles_post_ra>
